<compile_context>
chip_gen: v7x
topology: tpu7x:2x2x1
jax: 0.10.0
libtpu: 0.0.40
codegen_flags: <defaults>
</compile_context>

<pallas_src>
import functools

import jax
import jax.numpy as jnp
import numpy as np
from jax.experimental import pallas as pl
from jax.experimental.pallas import tpu as pltpu


# ----------------------------------------------------------------------------
# Config (matches the fields accessed by Loss_v4.forward)
# ----------------------------------------------------------------------------
LOSS_CONFIG = {
    "s": 30.0,                  # ArcFace scale
    "m": 0.5,                   # ArcFace angular margin
    "arcloss_start_epoch": 1,   # before this epoch: plain logits
}
FOCAL_GAMMA = 2.0  # TODO(synk): FocalLoss class not provided in the spec; assuming
                   # standard sigmoid focal loss (gamma=2, no alpha), mean reduction.

_LANE = 128
_SUBLANE = 8
_FC_TILE_BYTES = 4 * 1024 * 1024        # target fc-tile footprint per pipeline step
_VMEM_LIMIT_BYTES = 32 * 1024 * 1024    # explicit scoped-VMEM budget (fits all gens)


# ----------------------------------------------------------------------------
# Pallas kernel
# ----------------------------------------------------------------------------
def _loss_kernel(cos_ref, lab_ref, focal_ref, acc_ref, *,
                 s, cos_m, sin_m, border, gamma, use_arc,
                 total_b, total_c, mask_b, mask_c):
    i = pl.program_id(0)   # B-tile axis ("parallel": one resident output block per i)
    j = pl.program_id(1)   # C-tile axis ("arbitrary": sequential reduction)

    # Zero this B-tile's resident partial accumulators on its first C step.
    @pl.when(j == 0)
    def _():
        focal_ref[...] = jnp.zeros_like(focal_ref)
        acc_ref[...] = jnp.zeros_like(acc_ref)

    # Native-dtype loads; upcast / threshold in-kernel (no wrapper HBM passes).
    cos = cos_ref[...].astype(jnp.float32)
    lab = lab_ref[...]
    if lab.dtype == jnp.bool_:
        pos = lab
    elif jnp.issubdtype(lab.dtype, jnp.floating):
        pos = lab > 0.5
    else:
        pos = lab > 0

    if use_arc:
        # ArcFace margin applied at label positions (== the nonzero-index scatter
        # in the torch code, since labels are a binary multi-hot map).
        sin = jnp.sqrt(jnp.maximum(1.0 - cos * cos, 0.0))
        phai = cos * cos_m - sin * sin_m
        phai = jnp.where(cos > border, phai, -2.0 - phai)
        x = s * jnp.where(pos, phai, cos)
    else:
        x = cos

    # Sigmoid focal loss — numerically stable, transcendental-lean:
    #   e        = exp(-|x|)
    #   1 - p_t  = where(pos == (x > 0), e, 1) / (1 + e)
    #   -log p_t = log1p(e) + relu(where(pos, -x, x))
    x_pos = x > 0.0
    e = jnp.exp(-jnp.abs(x))
    log1pe = jnp.log1p(e)
    d = 1.0 + e
    inv = pl.reciprocal(d, approx=True)
    inv = inv * (2.0 - d * inv)                      # one Newton step (VALU, ~free)
    om = jnp.where(pos == x_pos, e, 1.0) * inv       # 1 - p_t
    ce = log1pe + jnp.maximum(jnp.where(pos, -x, x), 0.0)   # -log(p_t)
    if gamma == 2.0:
        mod = om * om                                # VALU square, no EUP pow chain
    else:
        mod = om ** gamma
    focal = mod * ce

    # Accuracy: (score > 0) == (label > 0.5)
    correct = (x_pos == pos).astype(jnp.float32)

    # Mask ragged edges of the last tiles (cdiv grid).  Static no-op when aligned.
    if mask_b or mask_c:
        tb, tc = focal.shape
        valid = None
        if mask_b:
            rows = jax.lax.broadcasted_iota(jnp.int32, (tb, tc), 0)
            valid = rows < (total_b - i * tb)
        if mask_c:
            cols = jax.lax.broadcasted_iota(jnp.int32, (tb, tc), 1)
            vc = cols < (total_c - j * tc)
            valid = vc if valid is None else (valid & vc)
        focal = jnp.where(valid, focal, 0.0)
        correct = jnp.where(valid, correct, 0.0)

    # Per-tile partial: lane axis first (XLU), then sublane -> scalar, accumulated
    # (broadcast) into this B-tile's resident lane-dense (1, 8, 128) block.
    focal_ref[...] += jnp.sum(jnp.sum(focal, axis=1, keepdims=True))
    acc_ref[...] += jnp.sum(jnp.sum(correct, axis=1, keepdims=True))


# ----------------------------------------------------------------------------
# Tiling helpers
# ----------------------------------------------------------------------------
def _round_up(x, mult):
    return ((x + mult - 1) // mult) * mult


def _pick_tiles(B, C, fc_itemsize):
    """Lane-aligned tiles: grow the contiguous lane axis first (ideally full C),
    then fill the element budget along the sublane axis."""
    max_elems = max(_FC_TILE_BYTES // max(int(fc_itemsize), 1), _SUBLANE * _LANE)
    c_cap = max((max_elems // _SUBLANE) // _LANE * _LANE, _LANE)
    tile_c = min(_round_up(C, _LANE), c_cap)
    b_cap = max((max_elems // tile_c) // _SUBLANE * _SUBLANE, _SUBLANE)
    tile_b = min(_round_up(B, _SUBLANE), b_cap)
    return tile_b, tile_c


# ----------------------------------------------------------------------------
# Wrapper (Loss_v4.forward equivalent)
# ----------------------------------------------------------------------------
def loss_v4_forward(fc, label, epoch, training=True, config=LOSS_CONFIG,
                    tile_b=None, tile_c=None):
    """fc: [B, C] cosine logits (any float dtype); label: [B, C] multi-hot."""
    assert fc.ndim == 2 and fc.shape == label.shape
    B, C = fc.shape

    s = float(config["s"])
    m = float(config["m"])
    cos_m = float(np.cos(m))
    sin_m = float(np.sin(m))
    border = float(np.cos(np.pi - m))
    use_arc = bool(training and (epoch >= config["arcloss_start_epoch"]))

    auto_b, auto_c = _pick_tiles(B, C, fc.dtype.itemsize)
    tile_b = auto_b if tile_b is None else int(tile_b)
    tile_c = auto_c if tile_c is None else int(tile_c)
    nb = pl.cdiv(B, tile_b)
    nc = pl.cdiv(C, tile_c)
    mask_b = (B % tile_b) != 0
    mask_c = (C % tile_c) != 0

    kernel = functools.partial(
        _loss_kernel,
        s=s, cos_m=cos_m, sin_m=sin_m, border=border,
        gamma=FOCAL_GAMMA, use_arc=use_arc,
        total_b=B, total_c=C, mask_b=mask_b, mask_c=mask_c)

    in_bytes = B * C * (fc.dtype.itemsize + label.dtype.itemsize)
    cost = pl.CostEstimate(
        flops=(30 if use_arc else 22) * B * C,
        transcendentals=(3 + (1 if use_arc else 0)) * B * C,
        bytes_accessed=in_bytes + 2 * nb * _SUBLANE * _LANE * 4)

    focal_p, acc_p = pl.pallas_call(
        kernel,
        out_shape=(
            jax.ShapeDtypeStruct((nb, _SUBLANE, _LANE), jnp.float32),
            jax.ShapeDtypeStruct((nb, _SUBLANE, _LANE), jnp.float32),
        ),
        grid=(nb, nc),
        in_specs=[
            pl.BlockSpec((tile_b, tile_c), lambda i, j: (i, j)),
            pl.BlockSpec((tile_b, tile_c), lambda i, j: (i, j)),
        ],
        out_specs=(
            pl.BlockSpec((1, _SUBLANE, _LANE), lambda i, j: (i, 0, 0)),
            pl.BlockSpec((1, _SUBLANE, _LANE), lambda i, j: (i, 0, 0)),
        ),
        compiler_params=pltpu.CompilerParams(
            # B-tile axis parallel (megacore on v7x); C reduction axis sequential.
            dimension_semantics=("parallel", "arbitrary"),
            vmem_limit_bytes=_VMEM_LIMIT_BYTES,
        ),
        cost_estimate=cost,
    )(fc, label)

    inv_n = 1.0 / float(B * C)
    focal = jnp.sum(focal_p[:, 0, 0]) * inv_n
    acc = jnp.sum(acc_p[:, 0, 0]) * inv_n
    return {"focal": focal, "acc": acc, "total": focal}


# ----------------------------------------------------------------------------
# Pure-numpy reference (mirrors the torch module) for a sanity check
# ----------------------------------------------------------------------------
def _loss_v4_ref(fc, label, epoch, training=True, config=LOSS_CONFIG):
    s, m = config["s"], config["m"]
    cos_m, sin_m = np.cos(m), np.sin(m)
    border = np.cos(np.pi - m)
    cos = np.asarray(fc, dtype=np.float64)
    lab = (np.asarray(label) > 0.5)
    if training and epoch >= config["arcloss_start_epoch"]:
        sin = np.sqrt(np.maximum(1.0 - cos * cos, 0.0))
        phai = cos * cos_m - sin * sin_m
        phai = np.where(cos > border, phai, -2.0 - phai)
        score = s * np.where(lab, phai, cos)
    else:
        score = cos
    p = 1.0 / (1.0 + np.exp(-score))
    p_t = np.where(lab, p, 1.0 - p)
    ce = -np.where(lab, np.log(p), np.log(1.0 - p))
    focal = ((1.0 - p_t) ** FOCAL_GAMMA) * ce
    acc = ((score > 0.0) == lab).astype(np.float64)
    return float(focal.mean()), float(acc.mean())


# ----------------------------------------------------------------------------
# Demo
# ----------------------------------------------------------------------------
if __name__ == "__main__":
    B, C = 12, 1000  # deliberately non-(8,128)-aligned to exercise cdiv + masking
    key = jax.random.PRNGKey(0)
    k_fc, k_lab = jax.random.split(key)

    fc = jnp.tanh(jax.random.normal(k_fc, (B, C), dtype=jnp.float32))   # cosine logits
    label_f = (jax.random.uniform(k_lab, (B, C)) < 0.05).astype(jnp.float32)
    label_i8 = label_f.astype(jnp.int8)

    # 1) Default (large) tiles — single grid step, ArcFace margin active.
    out1 = loss_v4_forward(fc, label_f, epoch=2, training=True)
    # 2) Forced tiny tiles — multi-step (2 x 8) grid with ragged-edge masking on
    #    both axes and per-B-tile partial accumulation.
    out2 = loss_v4_forward(fc, label_f, epoch=2, training=True, tile_b=8, tile_c=128)
    # 3) Pre-ArcFace epoch (plain logits), int8 labels, ragged C tiles.
    out3 = loss_v4_forward(fc, label_i8, epoch=0, training=True, tile_b=8, tile_c=256)

    jax.block_until_ready(out1["total"])
    jax.block_until_ready(out2["total"])
    jax.block_until_ready(out3["total"])

    ref_arc = _loss_v4_ref(np.asarray(fc), np.asarray(label_f), epoch=2, training=True)
    ref_pre = _loss_v4_ref(np.asarray(fc), np.asarray(label_f), epoch=0, training=True)

    np.testing.assert_allclose(float(out1["focal"]), ref_arc[0], rtol=2e-3, atol=1e-5)
    np.testing.assert_allclose(float(out1["acc"]), ref_arc[1], rtol=2e-3, atol=1e-5)
    np.testing.assert_allclose(float(out2["focal"]), ref_arc[0], rtol=2e-3, atol=1e-5)
    np.testing.assert_allclose(float(out2["acc"]), ref_arc[1], rtol=2e-3, atol=1e-5)
    np.testing.assert_allclose(float(out3["focal"]), ref_pre[0], rtol=2e-3, atol=1e-5)
    np.testing.assert_allclose(float(out3["acc"]), ref_pre[1], rtol=2e-3, atol=1e-5)

    print("KERNEL_OK")
</pallas_src>

<mosaic_0001>
module attributes {stable_mosaic.version = 11 : i64} {
  func.func @_loss_kernel(%arg0: i32, %arg1: i32, %arg2: memref<16x1024xf32, #tpu.memory_space<vmem>>, %arg3: memref<16x1024xf32, #tpu.memory_space<vmem>>, %arg4: memref<1x8x128xf32, #tpu.memory_space<vmem>>, %arg5: memref<1x8x128xf32, #tpu.memory_space<vmem>>) attributes {dimension_semantics = [#tpu.dimension_semantics<parallel>, #tpu.dimension_semantics<arbitrary>], iteration_bounds = array<i64: 1, 1>, scalar_prefetch = 0 : i64, scratch_operands = 0 : i64, tpu.core_type = #tpu.core_type<tc>, window_params = [{transform_indices = @transform_0, window_bounds = array<i64: 16, 1024>}, {transform_indices = @transform_1, window_bounds = array<i64: 16, 1024>}, {transform_indices = @transform_2, window_bounds = array<i64: 1, 8, 128>}, {transform_indices = @transform_3, window_bounds = array<i64: 1, 8, 128>}]} {
    %c0_i32 = arith.constant 0 : i32
    %0 = arith.cmpi eq, %arg1, %c0_i32 : i32
    %1 = arith.extui %0 : i1 to i32
    %c0_i32_0 = arith.constant 0 : i32
    %2 = arith.cmpi ne, %1, %c0_i32_0 : i32
    scf.if %2 {
      %cst_38 = arith.constant 0.000000e+00 : f32
      %92 = vector.broadcast %cst_38 : f32 to vector<1x8x128xf32>
      %c0_39 = arith.constant 0 : index
      %c0_40 = arith.constant 0 : index
      %c0_41 = arith.constant 0 : index
      %93 = vector.load %arg4[%c0_39, %c0_40, %c0_41] : memref<1x8x128xf32, #tpu.memory_space<vmem>>, vector<1x8x128xf32>
      tpu.vector_store %arg4[%c0_39, %c0_40, %c0_41], %92 {strides = array<i32>} : memref<1x8x128xf32, #tpu.memory_space<vmem>>, vector<1x8x128xf32>,
      %cst_42 = arith.constant 0.000000e+00 : f32
      %94 = vector.broadcast %cst_42 : f32 to vector<1x8x128xf32>
      %c0_43 = arith.constant 0 : index
      %c0_44 = arith.constant 0 : index
      %c0_45 = arith.constant 0 : index
      %95 = vector.load %arg5[%c0_43, %c0_44, %c0_45] : memref<1x8x128xf32, #tpu.memory_space<vmem>>, vector<1x8x128xf32>
      tpu.vector_store %arg5[%c0_43, %c0_44, %c0_45], %94 {strides = array<i32>} : memref<1x8x128xf32, #tpu.memory_space<vmem>>, vector<1x8x128xf32>,
    } else {
    }
    %c0 = arith.constant 0 : index
    %c0_1 = arith.constant 0 : index
    %3 = vector.load %arg2[%c0, %c0_1] : memref<16x1024xf32, #tpu.memory_space<vmem>>, vector<16x1024xf32>
    %c0_2 = arith.constant 0 : index
    %c0_3 = arith.constant 0 : index
    %4 = vector.load %arg3[%c0_2, %c0_3] : memref<16x1024xf32, #tpu.memory_space<vmem>>, vector<16x1024xf32>
    %cst = arith.constant 5.000000e-01 : f32
    %5 = vector.broadcast %cst : f32 to vector<16x1024xf32>
    %6 = arith.cmpf ogt, %4, %5 : vector<16x1024xf32>
    %7 = arith.mulf %3, %3 : vector<16x1024xf32>
    %cst_4 = arith.constant 1.000000e+00 : f32
    %8 = vector.broadcast %cst_4 : f32 to vector<16x1024xf32>
    %9 = arith.subf %8, %7 : vector<16x1024xf32>
    %cst_5 = arith.constant 0.000000e+00 : f32
    %10 = vector.broadcast %cst_5 : f32 to vector<16x1024xf32>
    %11 = arith.maximumf %9, %10 : vector<16x1024xf32>
    %12 = math.sqrt %11 : vector<16x1024xf32>
    %cst_6 = arith.constant 0.87758255 : f32
    %13 = vector.broadcast %cst_6 : f32 to vector<16x1024xf32>
    %14 = arith.mulf %3, %13 : vector<16x1024xf32>
    %cst_7 = arith.constant 0.47942555 : f32
    %15 = vector.broadcast %cst_7 : f32 to vector<16x1024xf32>
    %16 = arith.mulf %12, %15 : vector<16x1024xf32>
    %17 = arith.subf %14, %16 : vector<16x1024xf32>
    %cst_8 = arith.constant -0.87758255 : f32
    %18 = vector.broadcast %cst_8 : f32 to vector<16x1024xf32>
    %19 = arith.cmpf ogt, %3, %18 : vector<16x1024xf32>
    %cst_9 = arith.constant -2.000000e+00 : f32
    %20 = vector.broadcast %cst_9 : f32 to vector<16x1024xf32>
    %21 = arith.subf %20, %17 : vector<16x1024xf32>
    %22 = arith.select %19, %17, %21 : vector<16x1024xi1>, vector<16x1024xf32>
    %23 = arith.select %6, %22, %3 : vector<16x1024xi1>, vector<16x1024xf32>
    %cst_10 = arith.constant 3.000000e+01 : f32
    %24 = vector.broadcast %cst_10 : f32 to vector<16x1024xf32>
    %25 = arith.mulf %24, %23 : vector<16x1024xf32>
    %cst_11 = arith.constant 0.000000e+00 : f32
    %26 = vector.broadcast %cst_11 : f32 to vector<16x1024xf32>
    %27 = arith.cmpf ogt, %25, %26 : vector<16x1024xf32>
    %28 = math.absf %25 : vector<16x1024xf32>
    %cst_12 = arith.constant 0.000000e+00 : f32
    %29 = vector.broadcast %cst_12 : f32 to vector<16x1024xf32>
    %30 = arith.subf %29, %28 : vector<16x1024xf32>
    %31 = math.exp %30 : vector<16x1024xf32>
    %32 = math.log1p %31 : vector<16x1024xf32>
    %cst_13 = arith.constant 1.000000e+00 : f32
    %33 = vector.broadcast %cst_13 : f32 to vector<16x1024xf32>
    %34 = arith.addf %33, %31 : vector<16x1024xf32>
    %35 = tpu.reciprocal %34 {approx = true} : vector<16x1024xf32> -> vector<16x1024xf32>
    %36 = arith.mulf %34, %35 : vector<16x1024xf32>
    %cst_14 = arith.constant 2.000000e+00 : f32
    %37 = vector.broadcast %cst_14 : f32 to vector<16x1024xf32>
    %38 = arith.subf %37, %36 : vector<16x1024xf32>
    %39 = arith.mulf %35, %38 : vector<16x1024xf32>
    %40 = arith.xori %6, %27 : vector<16x1024xi1>
    %cst_15 = arith.constant dense<true> : vector<16x1024xi1>
    %41 = arith.xori %40, %cst_15 : vector<16x1024xi1>
    %cst_16 = arith.constant 1.000000e+00 : f32
    %42 = vector.broadcast %cst_16 : f32 to vector<16x1024xf32>
    %43 = arith.select %41, %31, %42 : vector<16x1024xi1>, vector<16x1024xf32>
    %44 = arith.mulf %43, %39 : vector<16x1024xf32>
    %cst_17 = arith.constant 0.000000e+00 : f32
    %45 = vector.broadcast %cst_17 : f32 to vector<16x1024xf32>
    %46 = arith.subf %45, %25 : vector<16x1024xf32>
    %47 = arith.select %6, %46, %25 : vector<16x1024xi1>, vector<16x1024xf32>
    %cst_18 = arith.constant 0.000000e+00 : f32
    %48 = vector.broadcast %cst_18 : f32 to vector<16x1024xf32>
    %49 = arith.maximumf %47, %48 : vector<16x1024xf32>
    %50 = arith.addf %32, %49 : vector<16x1024xf32>
    %51 = arith.mulf %44, %44 : vector<16x1024xf32>
    %52 = arith.mulf %51, %50 : vector<16x1024xf32>
    %53 = arith.xori %27, %6 : vector<16x1024xi1>
    %cst_19 = arith.constant dense<true> : vector<16x1024xi1>
    %54 = arith.xori %53, %cst_19 : vector<16x1024xi1>
    %55 = arith.extui %54 : vector<16x1024xi1> to vector<16x1024xi32>
    %56 = arith.sitofp %55 : vector<16x1024xi32> to vector<16x1024xf32>
    %57 = tpu.iota {dimensions = array<i32: 0>} : vector<16x1024xi32>
    %c16_i32 = arith.constant 16 : i32
    %58 = arith.muli %arg0, %c16_i32 : i32
    %c12_i32 = arith.constant 12 : i32
    %59 = arith.subi %c12_i32, %58 : i32
    %60 = vector.broadcast %59 : i32 to vector<16x1024xi32>
    %61 = arith.cmpi slt, %57, %60 : vector<16x1024xi32>
    %62 = tpu.iota {dimensions = array<i32: 1>} : vector<16x1024xi32>
    %c1024_i32 = arith.constant 1024 : i32
    %63 = arith.muli %arg1, %c1024_i32 : i32
    %c1000_i32 = arith.constant 1000 : i32
    %64 = arith.subi %c1000_i32, %63 : i32
    %65 = vector.broadcast %64 : i32 to vector<16x1024xi32>
    %66 = arith.cmpi slt, %62, %65 : vector<16x1024xi32>
    %67 = arith.andi %61, %66 : vector<16x1024xi1>
    %cst_20 = arith.constant 0.000000e+00 : f32
    %68 = vector.broadcast %cst_20 : f32 to vector<16x1024xf32>
    %69 = arith.select %67, %52, %68 : vector<16x1024xi1>, vector<16x1024xf32>
    %cst_21 = arith.constant 0.000000e+00 : f32
    %70 = vector.broadcast %cst_21 : f32 to vector<16x1024xf32>
    %71 = arith.select %67, %56, %70 : vector<16x1024xi1>, vector<16x1024xf32>
    %c0_22 = arith.constant 0 : index
    %c0_23 = arith.constant 0 : index
    %c0_24 = arith.constant 0 : index
    %72 = vector.load %arg4[%c0_22, %c0_23, %c0_24] : memref<1x8x128xf32, #tpu.memory_space<vmem>>, vector<1x8x128xf32>
    %cst_25 = arith.constant dense<0.000000e+00> : vector<16xf32>
    %73 = vector.multi_reduction <add>, %69, %cst_25 [1] : vector<16x1024xf32> to vector<16xf32>
    %74 = vector.shape_cast %73 : vector<16xf32> to vector<16x1xf32>
    %75 = vector.shape_cast %74 : vector<16x1xf32> to vector<1x16x1xf32>
    %cst_26 = arith.constant dense<0.000000e+00> : vector<1xf32>
    %76 = vector.multi_reduction <add>, %75, %cst_26 [1, 2] : vector<1x16x1xf32> to vector<1xf32>
    %77 = vector.shape_cast %76 : vector<1xf32> to vector<1x1x1xf32>
    %78 = vector.extract %77[0, 0, 0] : f32 from vector<1x1x1xf32>
    %79 = vector.broadcast %78 : f32 to vector<1x8x128xf32>
    %80 = arith.addf %72, %79 : vector<1x8x128xf32>
    %c0_27 = arith.constant 0 : index
    %c0_28 = arith.constant 0 : index
    %c0_29 = arith.constant 0 : index
    %81 = vector.load %arg4[%c0_27, %c0_28, %c0_29] : memref<1x8x128xf32, #tpu.memory_space<vmem>>, vector<1x8x128xf32>
    tpu.vector_store %arg4[%c0_27, %c0_28, %c0_29], %80 {strides = array<i32>} : memref<1x8x128xf32, #tpu.memory_space<vmem>>, vector<1x8x128xf32>,
    %c0_30 = arith.constant 0 : index
    %c0_31 = arith.constant 0 : index
    %c0_32 = arith.constant 0 : index
    %82 = vector.load %arg5[%c0_30, %c0_31, %c0_32] : memref<1x8x128xf32, #tpu.memory_space<vmem>>, vector<1x8x128xf32>
    %cst_33 = arith.constant dense<0.000000e+00> : vector<16xf32>
    %83 = vector.multi_reduction <add>, %71, %cst_33 [1] : vector<16x1024xf32> to vector<16xf32>
    %84 = vector.shape_cast %83 : vector<16xf32> to vector<16x1xf32>
    %85 = vector.shape_cast %84 : vector<16x1xf32> to vector<1x16x1xf32>
    %cst_34 = arith.constant dense<0.000000e+00> : vector<1xf32>
    %86 = vector.multi_reduction <add>, %85, %cst_34 [1, 2] : vector<1x16x1xf32> to vector<1xf32>
    %87 = vector.shape_cast %86 : vector<1xf32> to vector<1x1x1xf32>
    %88 = vector.extract %87[0, 0, 0] : f32 from vector<1x1x1xf32>
    %89 = vector.broadcast %88 : f32 to vector<1x8x128xf32>
    %90 = arith.addf %82, %89 : vector<1x8x128xf32>
    %c0_35 = arith.constant 0 : index
    %c0_36 = arith.constant 0 : index
    %c0_37 = arith.constant 0 : index
    %91 = vector.load %arg5[%c0_35, %c0_36, %c0_37] : memref<1x8x128xf32, #tpu.memory_space<vmem>>, vector<1x8x128xf32>
    tpu.vector_store %arg5[%c0_35, %c0_36, %c0_37], %90 {strides = array<i32>} : memref<1x8x128xf32, #tpu.memory_space<vmem>>, vector<1x8x128xf32>,
    return
  }
  func.func @transform_0(%arg0: i32, %arg1: i32) -> (i32, i32) {
    %c0_i32 = arith.constant 0 : i32
    return %arg0, %arg1 : i32, i32
  }
  func.func @transform_1(%arg0: i32, %arg1: i32) -> (i32, i32) {
    %c0_i32 = arith.constant 0 : i32
    return %arg0, %arg1 : i32, i32
  }
  func.func @transform_2(%arg0: i32, %arg1: i32) -> (i32, i32, i32) {
    %c0_i32 = arith.constant 0 : i32
    %c0_i32_0 = arith.constant 0 : i32
    %c0_i32_1 = arith.constant 0 : i32
    return %arg0, %c0_i32, %c0_i32_0 : i32, i32, i32
  }
  func.func @transform_3(%arg0: i32, %arg1: i32) -> (i32, i32, i32) {
    %c0_i32 = arith.constant 0 : i32
    %c0_i32_0 = arith.constant 0 : i32
    %c0_i32_1 = arith.constant 0 : i32
    return %arg0, %c0_i32, %c0_i32_0 : i32, i32, i32
  }
}

</mosaic_0001>

<bundles_post_ra>
// kernel: tpu_custom_call.1
= control target key start
LH: loop header
LB: loop body
LE: loop exit
PB: predicated region body
PF: predicated region fallthrough
CT: control target
= control target key end

     0   :  { %9 = vsyncpa [#allocation3], 0  ;;  %s2853_s0 = inlined_call_operand.hbm [shape: f32[12,1000], index: 0, kind: input, shape index: {}]   ;;  %s2854_s1 = inlined_call_operand.hbm [shape: f32[12,1000], index: 1, kind: input, shape index: {}]   ;;  %s2855_s2 = inlined_call_operand.hbm [shape: f32[1,8,128], index: 2, kind: output, shape index: {0}]   ;;  %s2856_s3 = inlined_call_operand.hbm [shape: f32[1,8,128], index: 3, kind: output, shape index: {1}]  }
   0x1   :  { %10 = vsyncpa [#allocation6], 0 }
   0x2   :  { %11 = vsyncpa [#allocation4], 0 }
   0x3   :  { %12 = vsyncpa [#allocation9], 0  ;;  %s1308_s12 = smov [#allocation2]   ;;  %s1212_s16 = scalar_lea.hbm %s2853_s0, 2048 }
   0x4   :  { %s18_s13 = sshll.u32 %s1308_s12, 4  ;;  %p1213_p0 = scmp.ne.s32.totalorder %s2853_s0, %s1212_s16  ;;  %s19_s13 = int_to_ptr.vmem [resolvable:$true] %s18_s13 }
   0x5   :  { %p1216_p1 = scmp.lt.u32.totalorder %s1212_s16, %s2853_s0 }
   0x7   :  { %p1218_p2 = pnand %p1216_p1, %p1213_p0 }
   0x9   :  { %1221 = shalt.err (!%p1218_p2)
}
   0xa   :  { %s1222_s21 = scalar_lea.vmem %s19_s13, 2048  ;;  %p1227_p4 = scmp.lt.s32.totalorder %s19_s13, %s19_s13 }
   0xb   :  { %p1223_p3 = scmp.ne.s32.totalorder %s19_s13, %s1222_s21  ;;  %p1228_p5 = scmp.lt.s32.totalorder %s1222_s21, %s1222_s21 }
   0xd   :  { %p1229_p6 = por %p1228_p5, %p1227_p4 }
   0xf   :  { %p1230_p7 = pnand %p1229_p6, %p1223_p3 }
  0x11   :  { %1233 = shalt.err (!%p1230_p7)
}
  0x12   :  { %s1309_s22 = smov 1024   ;;  %s1310_s23 = smov 64  }
  0x13   :  { %24 = dma.hbm_to_vmem [thread:$0]  %s2853_s0, 2048, %s19_s13, [#allocation3], %s1309_s22, %s1309_s22, %s1310_s23  }
  0x14   :  { %s1311_s26 = smov [#allocation5]   ;;  %s1234_s30 = scalar_lea.hbm %s2854_s1, 2048 }
  0x15   :  { %s30_s27 = sshll.u32 %s1311_s26, 4  ;;  %p1235_p8 = scmp.ne.s32.totalorder %s2854_s1, %s1234_s30  ;;  %s31_s27 = int_to_ptr.vmem [resolvable:$true] %s30_s27 }
  0x16   :  { %p1238_p9 = scmp.lt.u32.totalorder %s1234_s30, %s2854_s1 }
  0x18   :  { %p1240_p10 = pnand %p1238_p9, %p1235_p8 }
  0x1a   :  { %1243 = shalt.err (!%p1240_p10)
}
  0x1b   :  { %s1244_s8 = scalar_lea.vmem %s31_s27, 2048  ;;  %p1249_p12 = scmp.lt.s32.totalorder %s31_s27, %s31_s27 }
  0x1c   :  { %p1245_p11 = scmp.ne.s32.totalorder %s31_s27, %s1244_s8  ;;  %p1250_p13 = scmp.lt.s32.totalorder %s1244_s8, %s1244_s8 }
  0x1e   :  { %p1251_p0 = por %p1250_p13, %p1249_p12 }
  0x20   :  { %p1252_p1 = pnand %p1251_p0, %p1245_p11 }
  0x22   :  { %1255 = shalt.err (!%p1252_p1)
}
  0x23   :  { %36 = dma.hbm_to_vmem [thread:$0]  %s2854_s1, 2048, %s31_s27, [#allocation6], %s1309_s22, %s1309_s22, %s1310_s23  }
  0x24   :  { %1300 = dma.done.wait [#allocation3], 2048  }
  0x25   :  { %1301 = vsyncadd [#allocation3], 4294965248 }
  0x26   :  { %1302 = dma.done.wait [#allocation6], 2048  }
  0x27   :  { %1303 = vsyncadd [#allocation6], 4294965248  ;;  %v1360_v0 = vld [vmem:[#allocation2] sm:$0xff]  ;;  %v1362_v1 = vld [vmem:[#allocation2 + $0x8] sm:$0xff]  ;;  %s1314_s1 = smov [#allocation7]   ;;  %s1315_s12 = smov [#allocation8]  }
  0x28   :  { %v1364_v2 = vld [vmem:[#allocation2 + $0x10] sm:$0xff]  ;;  %v1366_v3 = vld [vmem:[#allocation2 + $0x18] sm:$0xff]  ;;  %v1368_v4 = vld [vmem:[#allocation2 + $0x20] sm:$0xff]  ;;  %v97_v6 = vmul.f32 %v1360_v0, %v1360_v0  ;;  %v98_v7 = vmul.f32 %v1362_v1, %v1362_v1  ;;  %v1413_v32 = vmul.f32 0.87758255, %v1360_v0  ;;  %s1032_s10 = sshll.u32 %s1314_s1, 4  ;;  %s1033_s10 = int_to_ptr.vmem [resolvable:$true] %s1032_s10 }
  0x29   :  { %v1370_v5 = vld [vmem:[#allocation2 + $0x28] sm:$0xff]  ;;  %v1376_v8 = vld [vmem:[#allocation2 + $0x30] sm:$0xff]  ;;  %v1378_v9 = vld [vmem:[#allocation2 + $0x38] sm:$0xff]  ;;  %v99_v10 = vmul.f32 %v1364_v2, %v1364_v2  ;;  %v100_v11 = vmul.f32 %v1366_v3, %v1366_v3  ;;  %v101_v12 = vmul.f32 %v1368_v4, %v1368_v4  ;;  %v1419_v33 = vmul.f32 0.87758255, %v1362_v1  ;;  %s1042_s13 = sshll.u32 %s1315_s12, 4  ;;  %p1261_p3 = scmp.lt.s32.totalorder %s1033_s10, %s1033_s10  ;;  %s1043_s13 = int_to_ptr.vmem [resolvable:$true] %s1042_s13 }
  0x2a   :  { %v102_v13 = vmul.f32 %v1370_v5, %v1370_v5  ;;  %v103_v14 = vmul.f32 %v1376_v8, %v1376_v8  ;;  %v113_v15 = vsub.f32 1.0, %v97_v6  ;;  %v104_v16 = vmul.f32 %v1378_v9, %v1378_v9  ;;  %v1441_v41 = vld [vmem:[#allocation5] sm:$0xff]  ;;  %v1447_v44 = vld [vmem:[#allocation5 + $0x8] sm:$0xff]  ;;  %v1467_v55 = vld [vmem:[#allocation5 + $0x10] sm:$0xff]  ;;  %s1256_s15 = scalar_lea.vmem %s1033_s10, 128 }
  0x2b   :  { %v114_v17 = vsub.f32 1.0, %v98_v7  ;;  %v115_v18 = vsub.f32 1.0, %v99_v10  ;;  %v116_v19 = vsub.f32 1.0, %v100_v11  ;;  %v117_v20 = vsub.f32 1.0, %v101_v12  ;;  %2955 = vst [vmem:[#allocation14_spill] sm:$0xff] %v1441_v41  ;;  %2956 = vst [vmem:[#allocation15_spill] sm:$0xff] %v1447_v44  ;;  %p1257_p2 = scmp.ne.s32.totalorder %s1033_s10, %s1256_s15  ;;  %p1262_p4 = scmp.lt.s32.totalorder %s1256_s15, %s1256_s15 }
  0x2c   :  { %v118_v21 = vsub.f32 1.0, %v102_v13  ;;  %v119_v22 = vsub.f32 1.0, %v103_v14  ;;  %v1392_v23 = vmax.f32 %v113_v15, 0.0  ;;  %v120_v24 = vsub.f32 1.0, %v104_v16  ;;  %2957 = vst [vmem:[#allocation16_spill] sm:$0xff] %v1467_v55  ;;  %v1469_v56 = vld [vmem:[#allocation5 + $0x18] sm:$0xff] }
  0x2d   :  { %v1394_v25 = vmax.f32 %v114_v17, 0.0  ;;  %v1396_v26 = vmax.f32 %v115_v18, 0.0  ;;  %v1398_v27 = vmax.f32 %v116_v19, 0.0  ;;  %v1400_v28 = vmax.f32 %v117_v20, 0.0  ;;  %2958 = vst [vmem:[#allocation17_spill] sm:$0xff] %v1469_v56  ;;  %v1479_v61 = vld [vmem:[#allocation5 + $0x20] sm:$0xff]  ;;  %p1263_p5 = por %p1262_p4, %p1261_p3 }
  0x2e   :  { %1084 = vrsqrt.f32 %v1392_v23  ;;  %v1403_v29 = vmax.f32 %v118_v21, 0.0  ;;  %v1406_v30 = vmax.f32 %v119_v22, 0.0  ;;  %v1409_v31 = vmax.f32 %v120_v24, 0.0  ;;  %2959 = vst [vmem:[#allocation18_spill] sm:$0xff] %v1479_v61  ;;  %v1481_v62 = vld [vmem:[#allocation5 + $0x28] sm:$0xff]  ;;  %v1483_v63 = vld [vmem:[#allocation5 + $0x30] sm:$0xff] }
  0x2f   :  { %1086 = vrsqrt.f32 %v1394_v25  ;;  %vm147_vm0 = vcmp.eq.f32.partialorder %v1392_v23, inf  ;;  %vm149_vm1 = vcmp.eq.f32.partialorder %v1392_v23, 0.0  ;;  %v150_v34 = vand.u32 2147483648, %v1392_v23  ;;  %2960 = vst [vmem:[#allocation19_spill] sm:$0xff] %v1481_v62  ;;  %2961 = vst [vmem:[#allocation20_spill] sm:$0xff] %v1483_v63  ;;  %v1494_v12 = vld [vmem:[#allocation5 + $0x38] sm:$0xff]  ;;  %p1264_p6 = pnand %p1263_p5, %p1257_p2 }
  0x30   :  { %1088 = vrsqrt.f32 %v1396_v26  ;;  %vm154_vm2 = vcmp.eq.f32.partialorder %v1394_v25, inf  ;;  %vm156_vm3 = vcmp.eq.f32.partialorder %v1394_v25, 0.0  ;;  %v157_v35 = vand.u32 2147483648, %v1394_v25  ;;  %2962 = vst [vmem:[#allocation21_spill] sm:$0xff] %v1494_v12 }
  0x31   :  { %1090 = vrsqrt.f32 %v1398_v27  ;;  %vm161_vm4 = vcmp.eq.f32.partialorder %v1396_v26, inf  ;;  %vm163_vm5 = vcmp.eq.f32.partialorder %v1396_v26, 0.0  ;;  %v164_v36 = vand.u32 2147483648, %v1396_v26 }
  0x32   :  { %1092 = vrsqrt.f32 %v1400_v28  ;;  %vm168_vm6 = vcmp.eq.f32.partialorder %v1398_v27, inf  ;;  %vm170_vm7 = vcmp.eq.f32.partialorder %v1398_v27, 0.0  ;;  %v171_v37 = vand.u32 2147483648, %v1398_v27 }
  0x33   :  { %1094 = vrsqrt.f32 %v1403_v29  ;;  %vm175_vm8 = vcmp.eq.f32.partialorder %v1400_v28, inf  ;;  %vm177_vm9 = vcmp.eq.f32.partialorder %v1400_v28, 0.0  ;;  %v178_v38 = vand.u32 2147483648, %v1400_v28 }
  0x34   :  { %1096 = vrsqrt.f32 %v1406_v30  ;;  %vm182_vm10 = vcmp.eq.f32.partialorder %v1403_v29, inf  ;;  %vm184_vm11 = vcmp.eq.f32.partialorder %v1403_v29, 0.0  ;;  %v185_v39 = vand.u32 2147483648, %v1403_v29 }
  0x35   :  { %1098 = vrsqrt.f32 %v1409_v31  ;;  %vm189_vm12 = vcmp.eq.f32.partialorder %v1406_v30, inf  ;;  %v192_v42 = vand.u32 2147483648, %v1406_v30  ;;  %v199_v46 = vand.u32 2147483648, %v1409_v31 }
  0x36   :  { %v1452_v47 = vmul.f32 0.87758255, %v1364_v2  ;;  %v1455_v48 = vmul.f32 0.87758255, %v1366_v3  ;;  %v1459_v51 = vmul.f32 0.87758255, %v1368_v4 }
  0x37   :  { %v1462_v52 = vmul.f32 0.87758255, %v1370_v5  ;;  %v1465_v53 = vmul.f32 0.87758255, %v1376_v8  ;;  %v1476_v59 = vmul.f32 0.87758255, %v1378_v9 }
  0x38   :  { %v1085_v40 = vpop.eup %1084  ;;  %vm2867_vm13 = vcmp.gt.f32.partialorder %v1469_v56, 0.5  ;;  %vm2863_vm14 = vcmp.gt.f32.partialorder %v1481_v62, 0.5  ;;  %vm2860_vm15 = vcmp.gt.f32.partialorder %v1483_v63, 0.5 }
  0x39   :  { %v1087_v43 = vpop.eup %1086  ;;  %v146_v45 = vmul.f32 %v1085_v40, %v1392_v23 }
  0x3a   :  { %v1089_v49 = vpop.eup %1088  ;;  %v153_v50 = vmul.f32 %v1087_v43, %v1394_v25 }
  0x3b   :  { %v1091_v54 = vpop.eup %1090  ;;  %v148_v57 = vsel %vm147_vm0, %v1392_v23, %v146_v45  ;;  %v160_v58 = vmul.f32 %v1089_v49, %v1396_v26  ;;  %vm306_vm0 = vcmp.gt.f32.partialorder %v1362_v1, -0.87758255 }
  0x3c   :  { %v1093_v60 = vpop.eup %1092  ;;  %v151_v6 = vsel %vm149_vm1, %v150_v34, %v148_v57  ;;  %v155_v7 = vsel %vm154_vm2, %v1394_v25, %v153_v50  ;;  %v167_v10 = vmul.f32 %v1091_v54, %v1398_v27  ;;  %vm309_vm1 = vcmp.gt.f32.partialorder %v1368_v4, -0.87758255 }
  0x3d   :  { %v1095_v11 = vpop.eup %1094  ;;  %v158_v13 = vsel %vm156_vm3, %v157_v35, %v155_v7  ;;  %v162_v14 = vsel %vm161_vm4, %v1396_v26, %v160_v58  ;;  %v174_v15 = vmul.f32 %v1093_v60, %v1400_v28  ;;  %v273_v16 = vmul.f32 0.47942555, %v151_v6 }
  0x3e   :  { %vm310_vm2 = vcmp.gt.f32.partialorder %v1370_v5, -0.87758255  ;;  %v1097_v17 = vpop.eup %1096  ;;  %v165_v18 = vsel %vm163_vm5, %v164_v36, %v162_v14  ;;  %v169_v19 = vsel %vm168_vm6, %v1398_v27, %v167_v10  ;;  %v181_v20 = vmul.f32 %v1095_v11, %v1403_v29 }
  0x3f   :  { %v274_v21 = vmul.f32 0.47942555, %v158_v13  ;;  %vm311_vm3 = vcmp.gt.f32.partialorder %v1376_v8, -0.87758255  ;;  %v1099_v22 = vpop.eup %1098  ;;  %vm2866_vm4 = vcmp.gt.f32.partialorder %v1479_v61, 0.5  ;;  %v172_v23 = vsel %vm170_vm7, %v171_v37, %v169_v19 }
  0x40   :  { %v176_v24 = vsel %vm175_vm8, %v1400_v28, %v174_v15  ;;  %v188_v25 = vmul.f32 %v1097_v17, %v1406_v30  ;;  %v275_v26 = vmul.f32 0.47942555, %v165_v18  ;;  %vm312_vm5 = vcmp.gt.f32.partialorder %v1378_v9, -0.87758255 }
  0x41   :  { %vm2857_vm6 = vcmp.gt.f32.partialorder %v1494_v12, 0.5  ;;  %v179_v34 = vsel %vm177_vm9, %v178_v38, %v176_v24  ;;  %v183_v27 = vsel %vm182_vm10, %v1403_v29, %v181_v20  ;;  %v195_v35 = vmul.f32 %v1099_v22, %v1409_v31 }
  0x42   :  { %v276_v36 = vmul.f32 0.47942555, %v172_v23  ;;  %v186_v37 = vsel %vm184_vm11, %v185_v39, %v183_v27  ;;  %v190_v40 = vsel %vm189_vm12, %v1406_v30, %v188_v25  ;;  %v277_v43 = vmul.f32 0.47942555, %v179_v34 }
  0x43   :  { %v289_v28 = vsub.f32 %v1413_v32, %v273_v16  ;;  %vm2963_vm7 = vcmp.eq.f32.partialorder %v1406_v30, 0.0  ;;  %vm2964_vm8 = vcmp.eq.f32.partialorder %v1409_v31, inf  ;;  %v278_v49 = vmul.f32 0.47942555, %v186_v37 }
  0x44   :  { %v193_v38 = vsel %vm2963_vm7, %v192_v42, %v190_v40  ;;  %v197_v45 = vsel %vm2964_vm8, %v1409_v31, %v195_v35  ;;  %v290_v29 = vsub.f32 %v1419_v33, %v274_v21  ;;  %vm2965_vm9 = vcmp.eq.f32.partialorder %v1409_v31, 0.0 }
  0x45   :  { %v200_v39 = vsel %vm2965_vm9, %v199_v46, %v197_v45  ;;  %v279_v50 = vmul.f32 0.47942555, %v193_v38  ;;  %v291_v32 = vsub.f32 %v1452_v47, %v275_v26  ;;  %v292_v54 = vsub.f32 %v1455_v48, %v276_v36 }
  0x46   :  { %v280_v57 = vmul.f32 0.47942555, %v200_v39  ;;  %v293_v30 = vsub.f32 %v1459_v51, %v277_v43  ;;  %v294_v42 = vsub.f32 %v1462_v52, %v278_v49  ;;  %v321_v58 = vsub.f32 -2.0, %v289_v28 }
  0x47   :  { %v295_v60 = vsub.f32 %v1465_v53, %v279_v50  ;;  %v322_v6 = vsub.f32 -2.0, %v290_v29  ;;  %v323_v33 = vsub.f32 -2.0, %v291_v32  ;;  %v324_v7 = vsub.f32 -2.0, %v292_v54 }
  0x48   :  { %v296_v10 = vsub.f32 %v1476_v59, %v280_v57  ;;  %v325_v31 = vsub.f32 -2.0, %v293_v30  ;;  %v326_v46 = vsub.f32 -2.0, %v294_v42  ;;  %vm2966_vm10 = vcmp.gt.f32.partialorder %v1360_v0, -0.87758255 }
  0x49   :  { %v337_v47 = vsel %vm2966_vm10, %v289_v28, %v321_v58  ;;  %v327_v11 = vsub.f32 -2.0, %v295_v60  ;;  %v338_v48 = vsel %vm306_vm0, %v290_v29, %v322_v6  ;;  %vm2967_vm11 = vcmp.gt.f32.partialorder %v1364_v2, -0.87758255 }
  0x4a   :  { %v339_v51 = vsel %vm2967_vm11, %v291_v32, %v323_v33  ;;  %vm2968_vm12 = vcmp.gt.f32.partialorder %v1366_v3, -0.87758255  ;;  %v328_v53 = vsub.f32 -2.0, %v296_v10  ;;  %v341_v13 = vsel %vm309_vm1, %v293_v30, %v325_v31 }
  0x4b   :  { %v340_v52 = vsel %vm2968_vm12, %v292_v54, %v324_v7  ;;  %v342_v59 = vsel %vm310_vm2, %v294_v42, %v326_v46  ;;  %vm2969_vm7 = vcmp.gt.f32.partialorder %v1441_v41, 0.5  ;;  %v343_v15 = vsel %vm311_vm3, %v295_v60, %v327_v11  ;;  %v1676_v42 = vld [vmem:[#allocation2 + $0x40] sm:$0xff] }
  0x4c   :  { %v353_v14 = vsel %vm2969_vm7, %v337_v47, %v1360_v0  ;;  %vm2970_vm0 = vcmp.gt.f32.partialorder %v1447_v44, 0.5  ;;  %vm2971_vm8 = vcmp.gt.f32.partialorder %v1467_v55, 0.5  ;;  %v356_v18 = vsel %vm2867_vm13, %v340_v52, %v1366_v3  ;;  %vm2980_vm11 = vmmov %vm2969_vm7 }
  0x4d   :  { %v354_v16 = vsel %vm2970_vm0, %v338_v48, %v1362_v1  ;;  %v355_v17 = vsel %vm2971_vm8, %v339_v51, %v1364_v2  ;;  %v344_v19 = vsel %vm312_vm5, %v296_v10, %v328_v53  ;;  %v357_v0 = vsel %vm2866_vm4, %v341_v13, %v1368_v4 }
  0x4e   :  { %v358_v20 = vsel %vm2863_vm14, %v342_v59, %v1370_v5  ;;  %v359_v1 = vsel %vm2860_vm15, %v343_v15, %v1376_v8  ;;  %v360_v2 = vsel %vm2857_vm6, %v344_v19, %v1378_v9  ;;  %v1602_v3 = vmul.f32 30.0, %v353_v14 }
  0x4f   :  { %v1604_v21 = vmul.f32 30.0, %v354_v16  ;;  %v1606_v22 = vmul.f32 30.0, %v355_v17  ;;  %v1608_v23 = vmul.f32 30.0, %v356_v18  ;;  %v1610_v4 = vmul.f32 30.0, %v357_v0 }
  0x50   :  { %2972 = vst [vmem:[#allocation22_spill] sm:$0xff] %v1602_v3  ;;  %v1612_v24 = vmul.f32 30.0, %v358_v20  ;;  %v1614_v5 = vmul.f32 30.0, %v359_v1  ;;  %v1616_v25 = vmul.f32 30.0, %v360_v2  ;;  %vm385_vm1 = vcmp.gt.f32.partialorder %v1602_v3, 0.0 }
  0x51   :  { %2973 = vst [vmem:[#allocation23_spill] sm:$0xff] %v1604_v21  ;;  %2974 = vst [vmem:[#allocation24_spill] sm:$0xff] %v1606_v22  ;;  %vm386_vm2 = vcmp.gt.f32.partialorder %v1604_v21, 0.0  ;;  %vm387_vm3 = vcmp.gt.f32.partialorder %v1606_v22, 0.0  ;;  %vm388_vm5 = vcmp.gt.f32.partialorder %v1608_v23, 0.0  ;;  %vm389_vm9 = vcmp.gt.f32.partialorder %v1610_v4, 0.0 }
  0x52   :  { %2975 = vst [vmem:[#allocation25_spill] sm:$0xff] %v1608_v23  ;;  %2976 = vst [vmem:[#allocation26_spill] sm:$0xff] %v1610_v4  ;;  %vm390_vm10 = vcmp.gt.f32.partialorder %v1612_v24, 0.0  ;;  %vm391_vm7 = vcmp.gt.f32.partialorder %v1614_v5, 0.0  ;;  %vm392_vm0 = vcmp.gt.f32.partialorder %v1616_v25, 0.0  ;;  %vm2983_vm8 = vcmp.gt.f32.partialorder %v1447_v44, 0.5 }
  0x53   :  { %2977 = vst [vmem:[#allocation27_spill] sm:$0xff] %v1612_v24  ;;  %2978 = vst [vmem:[#allocation28_spill] sm:$0xff] %v1614_v5  ;;  %v401_v9 = vand.u32 2147483647, %v1602_v3  ;;  %v402_v26 = vand.u32 2147483647, %v1604_v21  ;;  %v881_v7 = vlaneseq  ;;  %v105_v59 = vmul.f32 %v1676_v42, %v1676_v42 }
  0x54   :  { %2979 = vst [vmem:[#allocation29_spill] sm:$0xff] %v1616_v25  ;;  %vm1626_vm12 = vmxor %vm2980_vm11, %vm385_vm1  ;;  %v403_v27 = vand.u32 2147483647, %v1606_v22  ;;  %v404_v35 = vand.u32 2147483647, %v1608_v23  ;;  %vm2986_vm1 = vcmp.gt.f32.partialorder %v1467_v55, 0.5 }
  0x55   :  { %vm1636_vm6 = vmxor %vm2983_vm8, %vm386_vm2  ;;  %v405_v36 = vand.u32 2147483647, %v1610_v4  ;;  %v406_v40 = vand.u32 2147483647, %v1612_v24  ;;  %v407_v43 = vand.u32 2147483647, %v1614_v5 }
  0x56   :  { %vm1645_vm11 = vmxor %vm2986_vm1, %vm387_vm3  ;;  %v408_v28 = vand.u32 2147483647, %v1616_v25  ;;  %v417_v45 = vsub.f32 0.0, %v401_v9  ;;  %v418_v49 = vsub.f32 0.0, %v402_v26  ;;  %v419_v29 = vsub.f32 0.0, %v403_v27  ;;  %v1745_v9 = vld [vmem:[#allocation2 + $0x48] sm:$0xff] }
  0x57   :  { %vm1656_vm2 = vmxor %vm2867_vm13, %vm388_vm5  ;;  %v420_v39 = vsub.f32 0.0, %v404_v35  ;;  %v421_v32 = vsub.f32 0.0, %v405_v36  ;;  %v422_v54 = vsub.f32 0.0, %v406_v40  ;;  %v423_v57 = vsub.f32 0.0, %v407_v43  ;;  %v1754_v27 = vld [vmem:[#allocation2 + $0x50] sm:$0xff]  ;;  %v1766_v40 = vld [vmem:[#allocation2 + $0x58] sm:$0xff] }
  0x58   :  { %vm1664_vm3 = vmxor %vm2866_vm4, %vm389_vm9  ;;  %v433_v58 = vmul.f32 1.442695, %v417_v45  ;;  %v435_v60 = vmul.f32 1.442695, %v418_v49  ;;  %v437_v6 = vmul.f32 1.442695, %v419_v29  ;;  %v106_v29 = vmul.f32 %v1745_v9, %v1745_v9 }
  0x59   :  { %vm1672_vm5 = vmxor %vm2863_vm14, %vm390_vm10  ;;  %v424_v10 = vsub.f32 0.0, %v408_v28  ;;  %v439_v31 = vmul.f32 1.442695, %v420_v39  ;;  %vm2997_vm10 = vcmp.gt.f32.partialorder %v1494_v12, 0.5  ;;  %v441_v47 = vmul.f32 1.442695, %v421_v32 }
  0x5a   :  { %vm1682_vm9 = vmxor %vm2860_vm15, %vm391_vm7  ;;  %1100 = vpow2.f32 %v433_v58  ;;  %vm2871_vm1 = vmmov 1   ;;  %v890_v48 = vand.u32 127, %v881_v7  ;;  %v443_v51 = vmul.f32 1.442695, %v422_v54  ;;  %v1768_v43 = vld [vmem:[#allocation2 + $0x60] sm:$0xff]  ;;  %v1777_v45 = vld [vmem:[#allocation2 + $0x68] sm:$0xff] }
  0x5b   :  { %vm1690_vm8 = vmxor %vm2997_vm10, %vm392_vm0  ;;  %1102 = vpow2.f32 %v435_v60  ;;  %v2858_v53 = vmov 0.0   ;;  %v445_v14 = vmul.f32 1.442695, %v423_v57  ;;  %v447_v17 = vmul.f32 1.442695, %v424_v10  ;;  %v1779_v49 = vld [vmem:[#allocation2 + $0x70] sm:$0xff] }
  0x5c   :  { %vm1697_vm7 = vmxor %vm1626_vm12, %vm2871_vm1  ;;  %1104 = vpow2.f32 %v437_v6  ;;  %v3008_v20 = vmov 0  ;;  %v882_v2 = vshrl.u32 %v881_v7, 7  ;;  %v1743_v8 = vadd.s32 896, %v890_v48  ;;  %v1789_v32 = vld [vmem:[#allocation2 + $0x78] sm:$0xff] }
  0x5d   :  { %vm1704_vm0 = vmxor %vm1636_vm6, %vm2871_vm1  ;;  %v1056_v13 = vsel %vm1697_vm7, 1.0, %v2858_v53  ;;  %1106 = vpow2.f32 %v439_v31  ;;  %v3012_v26 = vmov 0  ;;  %v121_v35 = vsub.f32 1.0, %v105_v59 }
  0x5e   :  { %vm1716_vm12 = vmxor %vm1645_vm11, %vm2871_vm1  ;;  %v1057_v16 = vsel %vm1704_vm0, 1.0, %v2858_v53  ;;  %1108 = vpow2.f32 %v441_v47  ;;  %3011 = vst [vmem:[#allocation31_spill] sm:$0xff] %v1743_v8  ;;  %v3015_v36 = vmov 0  ;;  %v3018_v28 = vmov 0 }
  0x5f   :  { %vm1726_vm6 = vmxor %vm1656_vm2, %vm2871_vm1  ;;  %v1058_v19 = vsel %vm1716_vm12, 1.0, %v2858_v53  ;;  %v993_v0 = vadd.f32 %v1057_v16, %v1056_v13  ;;  %1110 = vpow2.f32 %v443_v51  ;;  %v1786_v50 = vadd.s32 8, %v882_v2 }
  0x60   :  { %vm1736_vm11 = vmxor %vm1664_vm3, %vm2871_vm1  ;;  %v1059_v1 = vsel %vm1726_vm6, 1.0, %v2858_v53  ;;  %1112 = vpow2.f32 %v445_v14  ;;  %v107_v54 = vmul.f32 %v1754_v27, %v1754_v27  ;;  %v108_v58 = vmul.f32 %v1766_v40, %v1766_v40 }
  0x61   :  { %v3009_v20 = vsel %vm1736_vm11, 4294967295, %v3008_v20  ;;  %vm1750_vm2 = vmxor %vm1672_vm5, %vm2871_vm1  ;;  %v994_v34 = vadd.f32 %v1058_v19, %v993_v0  ;;  %v1060_v37 = vsel %vm1736_vm11, 1.0, %v2858_v53  ;;  %1114 = vpow2.f32 %v447_v17  ;;  %3021 = vst [vmem:[#allocation35_spill] sm:$0xff] %v1786_v50 }
  0x62   :  { %3010 = vst [vmem:[#allocation30_spill] sm:$0xff] %v3009_v20  ;;  %v3013_v26 = vsel %vm1750_vm2, 4294967295, %v3012_v26  ;;  %vm1759_vm3 = vmxor %vm1682_vm9, %vm2871_vm1  ;;  %v1061_v39 = vsel %vm1750_vm2, 1.0, %v2858_v53  ;;  %vm2870_vm9 = vcmp.lt.s32.totalorder %v1743_v8, 1000  ;;  %v1798_v60 = vmax.f32 %v121_v35, 0.0 }
  0x63   :  { %3014 = vst [vmem:[#allocation32_spill] sm:$0xff] %v3013_v26  ;;  %v3016_v36 = vsel %vm1759_vm3, 4294967295, %v3015_v36  ;;  %vm1773_vm5 = vmxor %vm1690_vm8, %vm2871_vm1  ;;  %v995_v38 = vadd.f32 %v1059_v1, %v994_v34  ;;  %v1062_v33 = vsel %vm1759_vm3, 1.0, %v2858_v53  ;;  %v109_v7 = vmul.f32 %v1768_v43, %v1768_v43 }
  0x64   :  { %3017 = vst [vmem:[#allocation33_spill] sm:$0xff] %v3016_v36  ;;  %v3019_v28 = vsel %vm1773_vm5, 4294967295, %v3018_v28  ;;  %v1063_v57 = vsel %vm1773_vm5, 1.0, %v2858_v53  ;;  %v1800_v6 = vpop.eup %1100  ;;  %v110_v10 = vmul.f32 %v1777_v45, %v1777_v45  ;;  %v111_v31 = vmul.f32 %v1779_v49, %v1779_v49 }
  0x65   :  { %3020 = vst [vmem:[#allocation34_spill] sm:$0xff] %v3019_v28  ;;  %v996_v30 = vadd.f32 %v1060_v37, %v995_v38  ;;  %v1811_v46 = vpop.eup %1102  ;;  %v1814_v47 = vadd.f32 1.0, %v1800_v6  ;;  %v112_v51 = vmul.f32 %v1789_v32, %v1789_v32  ;;  %v122_v13 = vsub.f32 1.0, %v106_v29 }
  0x66   :  { %3022 = vst [vmem:[#allocation36_spill] sm:$0xff] %v1811_v46  ;;  %v1818_v59 = vpop.eup %1104  ;;  %v1821_v14 = vadd.f32 1.0, %v1811_v46  ;;  %v948_v16 = vsel %vm2870_vm9, %v1063_v57, 0.0  ;;  %v123_v17 = vsub.f32 1.0, %v107_v54  ;;  %1116 = vrsqrt.f32 %v1798_v60 }
  0x67   :  { %v997_v48 = vadd.f32 %v1061_v39, %v996_v30  ;;  %v1826_v19 = vpop.eup %1106  ;;  %v1829_v0 = vadd.f32 1.0, %v1818_v59  ;;  %1118 = vrcp.f32 %v1814_v47  ;;  %v124_v2 = vsub.f32 1.0, %v108_v58 }
  0x68   :  { %v1832_v34 = vpop.eup %1108  ;;  %v1835_v35 = vadd.f32 1.0, %v1826_v19  ;;  %1120 = vrcp.f32 %v1821_v14  ;;  %v125_v37 = vsub.f32 1.0, %v109_v7  ;;  %v126_v38 = vsub.f32 1.0, %v110_v10 }
  0x69   :  { %v998_v1 = vadd.f32 %v1062_v33, %v997_v48  ;;  %3023 = vst [vmem:[#allocation37_spill] sm:$0xff] %v1832_v34  ;;  %v1838_v29 = vpop.eup %1110  ;;  %v1841_v39 = vadd.f32 1.0, %v1832_v34  ;;  %1122 = vrcp.f32 %v1829_v0  ;;  %v127_v57 = vsub.f32 1.0, %v111_v31 }
  0x6a   :  { %3024 = vst [vmem:[#allocation38_spill] sm:$0xff] %v1838_v29  ;;  %v1844_v30 = vpop.eup %1112  ;;  %v1847_v58 = vadd.f32 1.0, %v1838_v29  ;;  %1124 = vrcp.f32 %v1835_v35  ;;  %v128_v33 = vsub.f32 1.0, %v112_v51  ;;  %v1850_v48 = vmax.f32 %v122_v13, 0.0 }
  0x6b   :  { %v999_v54 = vadd.f32 %v998_v1, %v948_v16  ;;  %3025 = vst [vmem:[#allocation39_spill] sm:$0xff] %v1844_v30  ;;  %v1852_v7 = vpop.eup %1114  ;;  %v1855_v10 = vadd.f32 1.0, %v1844_v30  ;;  %1126 = vrcp.f32 %v1841_v39  ;;  %v1858_v16 = vmax.f32 %v123_v17, 0.0 }
  0x6c   :  { %3026 = vst [vmem:[#allocation40_spill] sm:$0xff] %v1847_v58  ;;  %3027 = vst [vmem:[#allocation41_spill] sm:$0xff] %v1852_v7  ;;  %v1860_v31 = vmax.f32 %v124_v2, 0.0  ;;  %v1863_v1 = vadd.f32 1.0, %v1852_v7  ;;  %1128 = vrcp.f32 %v1847_v58  ;;  %v1866_v51 = vmax.f32 %v125_v37, 0.0 }
  0x6d   :  { %3028 = vst [vmem:[#allocation42_spill] sm:$0xff] %v1855_v10  ;;  %1000 = vadd.xlane.f32.xlu1 %v999_v54  ;;  %v1868_v13 = vmax.f32 %v126_v38, 0.0  ;;  %1130 = vrcp.f32 %v1855_v10  ;;  %v1877_v2 = vmax.f32 %v127_v57, 0.0  ;;  %v1886_v54 = vmax.f32 %v128_v33, 0.0 }
  0x6e   :  { %3029 = vst [vmem:[#allocation43_spill] sm:$0xff] %v1863_v1  ;;  %1132 = vrcp.f32 %v1863_v1  ;;  %vm203_vm10 = vcmp.eq.f32.partialorder %v1798_v60, inf  ;;  %vm205_vm8 = vcmp.eq.f32.partialorder %v1798_v60, 0.0  ;;  %v206_v33 = vand.u32 2147483648, %v1798_v60 }
  0x6f   :  { %1134 = vrsqrt.f32 %v1850_v48  ;;  %vm210_vm15 = vcmp.eq.f32.partialorder %v1850_v48, inf  ;;  %vm217_vm14 = vcmp.eq.f32.partialorder %v1858_v16, inf  ;;  %v220_v57 = vand.u32 2147483648, %v1858_v16 }
  0x70   :  { %v1117_v17 = vpop.eup %1116  ;;  %1136 = vrsqrt.f32 %v1858_v16  ;;  %v227_v41 = vand.u32 2147483648, %v1860_v31  ;;  %vm233_vm1 = vcmp.eq.f32.partialorder %v1866_v51, 0.0  ;;  %v234_v5 = vand.u32 2147483648, %v1866_v51 }
  0x71   :  { %v1119_v53 = vpop.eup %1118  ;;  %1138 = vrsqrt.f32 %v1860_v31  ;;  %v202_v12 = vmul.f32 %v1117_v17, %v1798_v60  ;;  %vm238_vm9 = vcmp.eq.f32.partialorder %v1868_v13, inf  ;;  %v241_v22 = vand.u32 2147483648, %v1868_v13 }
  0x72   :  { %v1121_v63 = vpop.eup %1120  ;;  %v641_v37 = vmul.f32 %v1119_v53, %v1814_v47  ;;  %1140 = vrsqrt.f32 %v1866_v51  ;;  %vm245_vm4 = vcmp.eq.f32.partialorder %v1877_v2, inf  ;;  %v248_v8 = vand.u32 2147483648, %v1877_v2 }
  0x73   :  { %v1123_v62 = vpop.eup %1122  ;;  %v642_v61 = vmul.f32 %v1121_v63, %v1821_v14  ;;  %1142 = vrsqrt.f32 %v1868_v13  ;;  %vm254_vm13 = vcmp.eq.f32.partialorder %v1886_v54, 0.0  ;;  %v3034_v11 = vand.u32 2147483648, %v1850_v48 }
  0x74   :  { %v1125_v38 = vpop.eup %1124  ;;  %v643_v56 = vmul.f32 %v1123_v62, %v1829_v0  ;;  %v657_v55 = vsub.f32 2.0, %v641_v37  ;;  %1144 = vrsqrt.f32 %v1877_v2  ;;  %v204_v37 = vsel %vm203_vm10, %v1798_v60, %v202_v12 }
  0x75   :  { %v1921_v17 = vpop.eup %1126  ;;  %v644_v44 = vmul.f32 %v1125_v38, %v1835_v35  ;;  %1146 = vrsqrt.f32 %v1886_v54  ;;  %v658_v23 = vsub.f32 2.0, %v642_v61  ;;  %v207_v36 = vsel %vm205_vm8, %v206_v33, %v204_v37 }
  0x76   :  { %v1927_v25 = vpop.eup %1128  ;;  %v1939_v4 = vmul.f32 %v1921_v17, %v1841_v39  ;;  %v659_v21 = vsub.f32 2.0, %v643_v56  ;;  %v673_v3 = vmul.f32 %v1119_v53, %v657_v55  ;;  %vm252_vm10 = vcmp.eq.f32.partialorder %v1886_v54, inf }
  0x77   :  { %v1935_v24 = vpop.eup %1130  ;;  %v1950_v28 = vmul.f32 %v1927_v25, %v1847_v58  ;;  %v660_v30 = vsub.f32 2.0, %v644_v44  ;;  %v255_v60 = vand.u32 2147483648, %v1886_v54  ;;  %vm3037_vm8 = vcmp.eq.f32.partialorder %v1858_v16, 0.0 }
  0x78   :  { %v1944_v12 = vpop.eup %1132  ;;  %v1954_v61 = vmul.f32 %v1935_v24, %v1855_v10  ;;  %v661_v58 = vsub.f32 2.0, %v1939_v4  ;;  %v674_v10 = vmul.f32 %v1121_v63, %v658_v23  ;;  %v675_v37 = vmul.f32 %v1123_v62, %v659_v21  ;;  %v2000_v63 = vld [vmem:[#allocation5 + $0x40] sm:$0xff] }
  0x79   :  { %3030 = vst [vmem:[#allocation44_spill] sm:$0xff] %v1944_v12  ;;  %v1135_v7 = vpop.eup %1134  ;;  %v1960_v55 = vmul.f32 %v1944_v12, %v1863_v1  ;;  %v3032_v1 = vsel %vm1697_vm7, %v1800_v6, 1.0  ;;  %vm3036_vm7 = vcmp.eq.f32.partialorder %v1860_v31, inf  ;;  %3039 = vst [vmem:[#allocation47_spill] sm:$0xff] %v2000_v63  ;;  %v271_v34 = vmul.f32 0.87758255, %v1779_v49 }
  0x7a   :  { %v1137_v29 = vpop.eup %1136  ;;  %v209_v56 = vmul.f32 %v1135_v7, %v1850_v48  ;;  %v1972_v26 = vmul.f32 %v3032_v1, %v673_v3  ;;  %v3053_v15 = vsub.f32 2.0, %v1950_v28  ;;  %1148 = vlog2.f32 %v1814_v47 }
  0x7b   :  { %3031 = vst [vmem:[#allocation45_spill] sm:$0xff] %v1960_v55  ;;  %v1139_v53 = vpop.eup %1138  ;;  %v216_v44 = vmul.f32 %v1137_v29, %v1858_v16  ;;  %v1980_v29 = vmul.f32 %v1125_v38, %v660_v30  ;;  %v270_v55 = vmul.f32 0.87758255, %v1777_v45  ;;  %1150 = vlog2.f32 %v1821_v14 }
  0x7c   :  { %v1141_v33 = vpop.eup %1140  ;;  %3033 = vst [vmem:[#allocation46_spill] sm:$0xff] %v1972_v26  ;;  %v211_v7 = vsel %vm210_vm15, %v1850_v48, %v209_v56  ;;  %v223_v12 = vmul.f32 %v1139_v53, %v1860_v31  ;;  %vm3035_vm15 = vcmp.eq.f32.partialorder %v1850_v48, 0.0  ;;  %v2002_v48 = vld [vmem:[#allocation5 + $0x48] sm:$0xff]  ;;  %v269_v26 = vmul.f32 0.87758255, %v1768_v43 }
  0x7d   :  { %v1143_v4 = vpop.eup %1142  ;;  %v218_v62 = vsel %vm217_vm14, %v1858_v16, %v216_v44  ;;  %v214_v1 = vsel %vm3035_vm15, %v3034_v11, %v211_v7  ;;  %v230_v53 = vmul.f32 %v1141_v33, %v1866_v51  ;;  %vm3038_vm14 = vcmp.eq.f32.partialorder %v1860_v31, 0.0  ;;  %3040 = vst [vmem:[#allocation48_spill] sm:$0xff] %v2002_v48  ;;  %v2014_v7 = vld [vmem:[#allocation5 + $0x60] sm:$0xff] }
  0x7e   :  { %v1145_v21 = vpop.eup %1144  ;;  %v225_v56 = vsel %vm3036_vm7, %v1860_v31, %v223_v12  ;;  %v221_v38 = vsel %vm3037_vm8, %v220_v57, %v218_v62  ;;  %v237_v3 = vmul.f32 %v1143_v4, %v1868_v13  ;;  %vm3041_vm15 = vcmp.eq.f32.partialorder %v1866_v51, inf  ;;  %v2010_v31 = vld [vmem:[#allocation5 + $0x50] sm:$0xff]  ;;  %3044 = vst [vmem:[#allocation51_spill] sm:$0xff] %v2014_v7 }
  0x7f   :  { %v1147_v30 = vpop.eup %1146  ;;  %v228_v44 = vsel %vm3038_vm14, %v227_v41, %v225_v56  ;;  %v244_v23 = vmul.f32 %v1145_v21, %v1877_v2  ;;  %v232_v12 = vsel %vm3041_vm15, %v1866_v51, %v230_v53  ;;  %v265_v16 = vmul.f32 0.87758255, %v1676_v42  ;;  %3042 = vst [vmem:[#allocation49_spill] sm:$0xff] %v2010_v31  ;;  %v2012_v41 = vld [vmem:[#allocation5 + $0x58] sm:$0xff]  ;;  %v2025_v56 = vld [vmem:[#allocation5 + $0x68] sm:$0xff]  ;;  %v2027_v53 = vld [vmem:[#allocation5 + $0x70] sm:$0xff] }
  0x80   :  { %v251_v33 = vmul.f32 %v1147_v30, %v1886_v54  ;;  %v266_v57 = vmul.f32 0.87758255, %v1745_v9  ;;  %3043 = vst [vmem:[#allocation50_spill] sm:$0xff] %v2012_v41  ;;  %v235_v4 = vsel %vm233_vm1, %v234_v5, %v232_v12  ;;  %v239_v62 = vsel %vm238_vm9, %v1868_v13, %v237_v3  ;;  %3045 = vst [vmem:[#allocation52_spill] sm:$0xff] %v2025_v56  ;;  %v2029_v30 = vld [vmem:[#allocation5 + $0x78] sm:$0xff] }
  0x81   :  { %v246_v21 = vsel %vm245_vm4, %v1877_v2, %v244_v23  ;;  %v267_v11 = vmul.f32 0.87758255, %v1754_v27  ;;  %3046 = vst [vmem:[#allocation53_spill] sm:$0xff] %v2027_v53  ;;  %3047 = vst [vmem:[#allocation54_spill] sm:$0xff] %v2029_v30  ;;  %vm3048_vm7 = vcmp.eq.f32.partialorder %v1868_v13, 0.0  ;;  %vm3049_vm1 = vcmp.eq.f32.partialorder %v1877_v2, 0.0 }
  0x82   :  { %v242_v51 = vsel %vm3048_vm7, %v241_v22, %v239_v62  ;;  %v249_v5 = vsel %vm3049_vm1, %v248_v8, %v246_v21  ;;  %v253_v3 = vsel %vm252_vm10, %v1886_v54, %v251_v33  ;;  %v268_v23 = vmul.f32 0.87758255, %v1766_v40 }
  0x83   :  { %v256_v12 = vsel %vm254_vm13, %v255_v60, %v253_v3  ;;  %v3050_v22 = vsel %vm1704_vm0, %v1811_v46, 1.0  ;;  %vm2913_vm4 = vcmp.gt.f32.partialorder %v2000_v63, 0.5  ;;  %vm2914_vm9 = vcmp.gt.f32.partialorder %v2002_v48, 0.5 }
  0x84   :  { %v2048_v8 = vmul.f32 %v3050_v22, %v674_v10  ;;  %vm2912_vm10 = vcmp.gt.f32.partialorder %v2010_v31, 0.5  ;;  %v272_v13 = vmul.f32 0.87758255, %v1789_v32  ;;  %v281_v2 = vmul.f32 0.47942555, %v207_v36 }
  0x85   :  { %v282_v54 = vmul.f32 0.47942555, %v214_v1  ;;  %v2055_v60 = vmul.f32 %v1921_v17, %v661_v58  ;;  %v283_v52 = vmul.f32 0.47942555, %v221_v38  ;;  %v284_v10 = vmul.f32 0.47942555, %v228_v44 }
  0x86   :  { %3051 = vst [vmem:[#allocation55_spill] sm:$0xff] %v2048_v8  ;;  %v285_v33 = vmul.f32 0.47942555, %v235_v4  ;;  %v3052_v62 = vsel %vm1716_vm12, %v1818_v59, 1.0  ;;  %v286_v58 = vmul.f32 0.47942555, %v242_v51  ;;  %v297_v21 = vsub.f32 %v265_v16, %v281_v2 }
  0x87   :  { %v2065_v36 = vmul.f32 %v3052_v62, %v675_v37  ;;  %v287_v17 = vmul.f32 0.47942555, %v249_v5  ;;  %v288_v1 = vmul.f32 0.47942555, %v256_v12  ;;  %v298_v3 = vsub.f32 %v266_v57, %v282_v54 }
  0x88   :  { %v299_v22 = vsub.f32 %v267_v11, %v283_v52  ;;  %v300_v8 = vsub.f32 %v268_v23, %v284_v10  ;;  %v301_v46 = vsub.f32 %v269_v26, %v285_v33  ;;  %v302_v20 = vsub.f32 %v270_v55, %v286_v58 }
  0x89   :  { %v303_v38 = vsub.f32 %v271_v34, %v287_v17  ;;  %vm313_vm7 = vcmp.gt.f32.partialorder %v1676_v42, -0.87758255  ;;  %v304_v44 = vsub.f32 %v272_v13, %v288_v1  ;;  %vm314_vm1 = vcmp.gt.f32.partialorder %v1745_v9, -0.87758255 }
  0x8a   :  { %vm315_vm12 = vcmp.gt.f32.partialorder %v1754_v27, -0.87758255  ;;  %vm316_vm14 = vcmp.gt.f32.partialorder %v1766_v40, -0.87758255  ;;  %v2075_v37 = vmul.f32 %v1927_v25, %v3053_v15  ;;  %vm317_vm15 = vcmp.gt.f32.partialorder %v1768_v43, -0.87758255 }
  0x8b   :  { %vm318_vm0 = vcmp.gt.f32.partialorder %v1777_v45, -0.87758255  ;;  %vm319_vm8 = vcmp.gt.f32.partialorder %v1779_v49, -0.87758255  ;;  %vm320_vm13 = vcmp.gt.f32.partialorder %v1789_v32, -0.87758255  ;;  %1152 = vlog2.f32 %v1829_v0 }
  0x8c   :  { %v329_v26 = vsub.f32 -2.0, %v297_v21  ;;  %v330_v34 = vsub.f32 -2.0, %v298_v3  ;;  %v331_v55 = vsub.f32 -2.0, %v299_v22  ;;  %v332_v16 = vsub.f32 -2.0, %v300_v8 }
  0x8d   :  { %v333_v57 = vsub.f32 -2.0, %v301_v46  ;;  %v334_v4 = vsub.f32 -2.0, %v302_v20  ;;  %v335_v11 = vsub.f32 -2.0, %v303_v38  ;;  %v336_v51 = vsub.f32 -2.0, %v304_v44 }
  0x8e   :  { %v345_v25 = vsel %vm313_vm7, %v297_v21, %v329_v26  ;;  %v346_v28 = vsel %vm314_vm1, %v298_v3, %v330_v34  ;;  %v347_v5 = vsel %vm315_vm12, %v299_v22, %v331_v55  ;;  %v348_v23 = vsel %vm316_vm14, %v300_v8, %v332_v16 }
  0x8f   :  { %v349_v12 = vsel %vm317_vm15, %v301_v46, %v333_v57  ;;  %v350_v13 = vsel %vm318_vm0, %v302_v20, %v334_v4  ;;  %v351_v2 = vsel %vm319_vm8, %v303_v38, %v335_v11  ;;  %v352_v54 = vsel %vm320_vm13, %v304_v44, %v336_v51 }
  0x90   :  { %v361_v52 = vsel %vm2913_vm4, %v345_v25, %v1676_v42  ;;  %v362_v8 = vsel %vm2914_vm9, %v346_v28, %v1745_v9  ;;  %v363_v46 = vsel %vm2912_vm10, %v347_v5, %v1754_v27  ;;  %vm3054_vm0 = vcmp.gt.f32.partialorder %v2012_v41, 0.5 }
  0x91   :  { %v364_v20 = vsel %vm3054_vm0, %v348_v23, %v1766_v40  ;;  %vm3055_vm8 = vcmp.gt.f32.partialorder %v2014_v7, 0.5  ;;  %vm3056_vm13 = vcmp.gt.f32.partialorder %v2025_v56, 0.5  ;;  %vm3057_vm14 = vcmp.gt.f32.partialorder %v2027_v53, 0.5 }
  0x92   :  { %v365_v10 = vsel %vm3055_vm8, %v349_v12, %v1768_v43  ;;  %v366_v42 = vsel %vm3056_vm13, %v350_v13, %v1777_v45  ;;  %v367_v9 = vsel %vm3057_vm14, %v351_v2, %v1779_v49  ;;  %vm3058_vm15 = vcmp.gt.f32.partialorder %v2029_v30, 0.5 }
  0x93   :  { %v368_v27 = vsel %vm3058_vm15, %v352_v54, %v1789_v32  ;;  %v2121_v33 = vmul.f32 30.0, %v361_v52  ;;  %v2123_v62 = vmul.f32 30.0, %v362_v8  ;;  %v2125_v40 = vmul.f32 30.0, %v363_v46 }
  0x94   :  { %v2127_v58 = vmul.f32 30.0, %v364_v20  ;;  %v2129_v43 = vmul.f32 30.0, %v365_v10  ;;  %v2131_v17 = vmul.f32 30.0, %v366_v42  ;;  %v2133_v45 = vmul.f32 30.0, %v367_v9  ;;  %v3094_v10 = vld [vmem:[#allocation37_spill] sm:$0xff] }
  0x95   :  { %3059 = vst [vmem:[#allocation56_spill] sm:$0xff] %v2121_v33  ;;  %3060 = vst [vmem:[#allocation57_spill] sm:$0xff] %v2123_v62  ;;  %v2136_v49 = vmul.f32 30.0, %v368_v27  ;;  %vm393_vm1 = vcmp.gt.f32.partialorder %v2121_v33, 0.0  ;;  %vm394_vm12 = vcmp.gt.f32.partialorder %v2123_v62, 0.0  ;;  %vm395_vm0 = vcmp.gt.f32.partialorder %v2125_v40, 0.0 }
  0x96   :  { %3061 = vst [vmem:[#allocation58_spill] sm:$0xff] %v2125_v40  ;;  %3062 = vst [vmem:[#allocation59_spill] sm:$0xff] %v2127_v58  ;;  %vm396_vm8 = vcmp.gt.f32.partialorder %v2127_v58, 0.0  ;;  %vm398_vm14 = vcmp.gt.f32.partialorder %v2131_v17, 0.0  ;;  %vm399_vm7 = vcmp.gt.f32.partialorder %v2133_v45, 0.0  ;;  %1154 = vlog2.f32 %v1835_v35 }
  0x97   :  { %3063 = vst [vmem:[#allocation60_spill] sm:$0xff] %v2129_v43  ;;  %3064 = vst [vmem:[#allocation61_spill] sm:$0xff] %v2131_v17  ;;  %v409_v1 = vand.u32 2147483647, %v2121_v33  ;;  %v410_v21 = vand.u32 2147483647, %v2123_v62  ;;  %1156 = vlog2.f32 %v1841_v39 }
  0x98   :  { %3065 = vst [vmem:[#allocation62_spill] sm:$0xff] %v2133_v45  ;;  %3066 = vst [vmem:[#allocation63_spill] sm:$0xff] %v2136_v49  ;;  %v411_v22 = vand.u32 2147483647, %v2125_v40  ;;  %v412_v38 = vand.u32 2147483647, %v2127_v58 }
  0x99   :  { %vm2146_vm15 = vmxor %vm2913_vm4, %vm393_vm1  ;;  %v413_v47 = vand.u32 2147483647, %v2129_v43  ;;  %vm3071_vm1 = vcmp.gt.f32.partialorder %v2010_v31, 0.5  ;;  %v414_v15 = vand.u32 2147483647, %v2131_v17  ;;  %v425_v16 = vsub.f32 0.0, %v409_v1 }
  0x9a   :  { %vm2157_vm13 = vmxor %vm2914_vm9, %vm394_vm12  ;;  %v415_v26 = vand.u32 2147483647, %v2133_v45  ;;  %v416_v34 = vand.u32 2147483647, %v2136_v49  ;;  %vm3074_vm12 = vcmp.gt.f32.partialorder %v2012_v41, 0.5  ;;  %v426_v57 = vsub.f32 0.0, %v410_v21 }
  0x9b   :  { %vm2166_vm4 = vmxor %vm3071_vm1, %vm395_vm0  ;;  %v427_v4 = vsub.f32 0.0, %v411_v22  ;;  %v428_v14 = vsub.f32 0.0, %v412_v38  ;;  %vm3077_vm0 = vcmp.gt.f32.partialorder %v2129_v43, 0.0  ;;  %vm3078_vm1 = vcmp.gt.f32.partialorder %v2014_v7, 0.5  ;;  %v1149_v22 = vpop.eup %1148 }
  0x9c   :  { %vm2178_vm9 = vmxor %vm3074_vm12, %vm396_vm8  ;;  %v429_v51 = vsub.f32 0.0, %v413_v47  ;;  %v430_v25 = vsub.f32 0.0, %v414_v15  ;;  %v431_v28 = vsub.f32 0.0, %v415_v26  ;;  %v432_v5 = vsub.f32 0.0, %v416_v34 }
  0x9d   :  { %vm2187_vm10 = vmxor %vm3078_vm1, %vm3077_vm0  ;;  %vm3081_vm8 = vcmp.gt.f32.partialorder %v2025_v56, 0.5  ;;  %v449_v23 = vmul.f32 1.442695, %v425_v16  ;;  %v451_v12 = vmul.f32 1.442695, %v426_v57  ;;  %vm3084_vm0 = vcmp.gt.f32.partialorder %v2027_v53, 0.5  ;;  %v1151_v16 = vpop.eup %1150 }
  0x9e   :  { %vm2195_vm12 = vmxor %vm3081_vm8, %vm398_vm14  ;;  %v453_v13 = vmul.f32 1.442695, %v427_v4  ;;  %v3087_v54 = vsel %vm1726_vm6, %v1826_v19, 1.0  ;;  %v455_v8 = vmul.f32 1.442695, %v428_v14  ;;  %vm3088_vm14 = vcmp.gt.f32.partialorder %v2136_v49, 0.0 }
  0x9f   :  { %vm2203_vm1 = vmxor %vm3084_vm0, %vm399_vm7  ;;  %v2213_v52 = vmul.f32 %v3087_v54, %v1980_v29  ;;  %vm3089_vm8 = vcmp.gt.f32.partialorder %v2029_v30, 0.5  ;;  %v468_v20 = vmul.f32 -0.5, %v1800_v6  ;;  %v3092_v35 = vsub.f32 2.0, %v1954_v61  ;;  %v3122_v29 = vld [vmem:[#allocation38_spill] sm:$0xff] }
  0xa0   :  { %vm2219_vm5 = vmxor %vm3089_vm8, %vm3088_vm14  ;;  %v3095_v42 = vsel %vm1736_vm11, %v3094_v10, 1.0  ;;  %1158 = vpow2.f32 %v449_v23  ;;  %v457_v27 = vmul.f32 1.442695, %v429_v51  ;;  %vm3096_vm6 = vmmov 1   ;;  %v1153_v51 = vpop.eup %1152  ;;  %v3115_v23 = vld [vmem:[#allocation45_spill] sm:$0xff] }
  0xa1   :  { %v679_v18 = vmul.f32 %v1935_v24, %v3092_v35  ;;  %v2233_v9 = vmul.f32 %v3095_v42, %v2055_v60  ;;  %vm2238_vm7 = vmxor %vm2146_vm15, %vm3096_vm6  ;;  %1160 = vpow2.f32 %v451_v12  ;;  %v459_v39 = vmul.f32 1.442695, %v430_v25  ;;  %v3149_v35 = vld [vmem:[#allocation42_spill] sm:$0xff] }
  0xa2   :  { %v461_v61 = vmul.f32 1.442695, %v431_v28  ;;  %vm2245_vm0 = vmxor %vm2157_vm13, %vm3096_vm6  ;;  %v3101_v60 = vmov 0.0   ;;  %1162 = vpow2.f32 %v453_v13  ;;  %v463_v32 = vmul.f32 1.442695, %v432_v5  ;;  %v3117_v13 = vld [vmem:[#allocation44_spill] sm:$0xff] }
  0xa3   :  { %v1064_v21 = vsel %vm2238_vm7, 1.0, %v3101_v60  ;;  %vm2255_vm11 = vmxor %vm2166_vm4, %vm3096_vm6  ;;  %v1065_v3 = vsel %vm2245_vm0, 1.0, %v3101_v60  ;;  %vm3104_vm13 = vcmp.lt.s32.totalorder %v1786_v50, 12  ;;  %1164 = vpow2.f32 %v455_v8 }
  0xa4   :  { %v949_v47 = vsel %vm3104_vm13, %v1064_v21, 0.0  ;;  %vm2267_vm15 = vmxor %vm2178_vm9, %vm3096_vm6  ;;  %v1066_v44 = vsel %vm2255_vm11, 1.0, %v3101_v60  ;;  %v469_v34 = vadd.f32 1.0, %v468_v20  ;;  %1166 = vpow2.f32 %v457_v27 }
  0xa5   :  { %vm3107_vm4 = vmmov %vm3104_vm13  ;;  %v1067_v55 = vsel %vm2267_vm15, 1.0, %v3101_v60  ;;  %1168 = vpow2.f32 %v459_v39  ;;  %v3111_v25 = vmov 0  ;;  %v471_v5 = vand.u32 2147483647, %v1800_v6 }
  0xa6   :  { %v950_v26 = vsel %vm3107_vm4, %v1065_v3, 0.0  ;;  %vm2279_vm14 = vmxor %vm2187_vm10, %vm3096_vm6  ;;  %v3116_v12 = vsub.f32 2.0, %v3115_v23  ;;  %1170 = vpow2.f32 %v461_v61  ;;  %v3118_v0 = vmov 0  ;;  %v3126_v61 = vld [vmem:[#allocation39_spill] sm:$0xff]  ;;  %v3137_v23 = vld [vmem:[#allocation40_spill] sm:$0xff] }
  0xa7   :  { %vm3110_vm9 = vmmov %vm3107_vm4  ;;  %v1002_v14 = vadd.f32 %v950_v26, %v949_v47  ;;  %v1068_v11 = vsel %vm2279_vm14, 1.0, %v3101_v60  ;;  %v3123_v42 = vsel %vm1750_vm2, %v3122_v29, 1.0  ;;  %v3127_v2 = vsel %vm1759_vm3, %v3126_v61, 1.0 }
  0xa8   :  { %v951_v4 = vsel %vm3110_vm9, %v1066_v44, 0.0  ;;  %vm2291_vm8 = vmxor %vm2195_vm12, %vm3096_vm6  ;;  %v680_v54 = vmul.f32 %v3117_v13, %v3116_v12  ;;  %v2319_v27 = vmul.f32 %v3123_v42, %v2075_v37  ;;  %v2325_v21 = vmul.f32 %v3127_v2, %v679_v18  ;;  %v1155_v44 = vpop.eup %1154  ;;  %v3152_v2 = vld [vmem:[#allocation43_spill] sm:$0xff] }
  0xa9   :  { %v3112_v25 = vsel %vm2291_vm8, 4294967295, %v3111_v25  ;;  %vm3114_vm10 = vmmov %vm3107_vm4  ;;  %v1069_v8 = vsel %vm2291_vm8, 1.0, %v3101_v60  ;;  %v1003_v20 = vadd.f32 %v1002_v14, %v951_v4  ;;  %1172 = vpow2.f32 %v463_v32  ;;  %v2344_v32 = vpop.eup %1156  ;;  %v3136_v14 = vld [vmem:[#allocation36_spill] sm:$0xff] }
  0xaa   :  { %3113 = vst [vmem:[#allocation30_spill] sm:$0xff] %v3112_v25  ;;  %v952_v28 = vsel %vm3114_vm10, %v1067_v55, 0.0  ;;  %vm2307_vm12 = vmxor %vm2203_vm1, %vm3096_vm6  ;;  %v3129_v3 = vmov 0  ;;  %v2339_v55 = vmul.f32 0.6931472, %v1149_v22  ;;  %v2342_v18 = vmul.f32 %v1800_v6, %v469_v34  ;;  %v2354_v12 = vpop.eup %1158  ;;  %v3138_v22 = vld [vmem:[#allocation34_spill] sm:$0xff] }
  0xab   :  { %v3119_v0 = vsel %vm2307_vm12, 4294967295, %v3118_v0  ;;  %3124 = vst [vmem:[#allocation45_spill] sm:$0xff] %v2319_v27  ;;  %3128 = vst [vmem:[#allocation44_spill] sm:$0xff] %v2325_v21  ;;  %v1070_v37 = vsel %vm2307_vm12, 1.0, %v3101_v60  ;;  %v1004_v26 = vadd.f32 %v1003_v20, %v952_v28  ;;  %vm2348_vm3 = vcmp.lt.f32.partialorder %v471_v5, 0.0004427343  ;;  %v2374_v42 = vpop.eup %1160 }
  0xac   :  { %3120 = vst [vmem:[#allocation37_spill] sm:$0xff] %v3119_v0  ;;  %vm2330_vm1 = vmxor %vm2219_vm5, %vm3096_vm6  ;;  %1174 = vlog2.f32 %v3137_v23  ;;  %vm3139_vm5 = vnez %v3138_v22  ;;  %v3140_v28 = vld [vmem:[#allocation41_spill] sm:$0xff]  ;;  %v3143_v5 = vld [vmem:[#allocation31_spill] sm:$0xff]  ;;  %v2384_v23 = vpop.eup %1162  ;;  %v2387_v22 = vadd.f32 1.0, %v2374_v42  ;;  %v2433_v45 = vmul.f32 0.6931472, %v1155_v44 }
  0xad   :  { %v3130_v3 = vsel %vm2330_vm1, 4294967295, %v3129_v3  ;;  %vm3132_vm13 = vmmov %vm3107_vm4  ;;  %v3141_v6 = vsel %vm3139_vm5, %v3140_v28, 1.0  ;;  %v1071_v13 = vsel %vm2330_vm1, 1.0, %v3101_v60  ;;  %vm3144_vm6 = vcmp.lt.s32.totalorder %v3143_v5, 1000 }
  0xae   :  { %3131 = vst [vmem:[#allocation32_spill] sm:$0xff] %v3130_v3  ;;  %v953_v47 = vsel %vm3132_vm13, %v1068_v11, 0.0  ;;  %vm3133_vm2 = vmmov %vm3107_vm4  ;;  %v477_v11 = vmul.f32 -0.5, %v3136_v14  ;;  %v2360_v34 = vmul.f32 %v3141_v6, %v680_v54  ;;  %1176 = vlog2.f32 %v3149_v35  ;;  %v2394_v35 = vpop.eup %1164 }
  0xaf   :  { %v954_v46 = vsel %vm3133_vm2, %v1069_v8, 0.0  ;;  %vm3145_vm4 = vmmov %vm3133_vm2  ;;  %v3146_v8 = vmov 0  ;;  %v1005_v20 = vadd.f32 %v1004_v26, %v953_v47  ;;  %v2377_v54 = vadd.f32 1.0, %v2354_v12  ;;  %3153 = vst [vmem:[#allocation36_spill] sm:$0xff] %v2387_v22  ;;  %v2402_v50 = vpop.eup %1166 }
  0xb0   :  { %3142 = vst [vmem:[#allocation38_spill] sm:$0xff] %v2360_v34  ;;  %vm2369_vm9 = vmand %vm3145_vm4, %vm3144_vm6  ;;  %v2381_v60 = vmul.f32 0.6931472, %v1151_v16  ;;  %1178 = vlog2.f32 %v3152_v2  ;;  %v486_v6 = vmul.f32 -0.5, %v1818_v59  ;;  %v2397_v16 = vadd.f32 1.0, %v2384_v23  ;;  %v2409_v30 = vpop.eup %1168 }
  0xb1   :  { %v3147_v8 = vsel %vm2369_vm9, 4294967295, %v3146_v8  ;;  %3150 = vst [vmem:[#allocation39_spill] sm:$0xff] %v2377_v54  ;;  %vm3151_vm10 = vmmov %vm3133_vm2  ;;  %v1006_v47 = vadd.f32 %v1005_v20, %v954_v46  ;;  %1180 = vrcp.f32 %v2377_v54  ;;  %v478_v2 = vadd.f32 1.0, %v477_v11 }
  0xb2   :  { %3148 = vst [vmem:[#allocation33_spill] sm:$0xff] %v3147_v8  ;;  %v955_v39 = vsel %vm3151_vm10, %v1070_v37, 0.0  ;;  %3154 = vst [vmem:[#allocation40_spill] sm:$0xff] %v2397_v16  ;;  %v956_v37 = vsel %vm2369_vm9, %v1071_v13, 0.0  ;;  %v2405_v46 = vadd.f32 1.0, %v2394_v35  ;;  %1182 = vrcp.f32 %v2387_v22  ;;  %v2418_v13 = vpop.eup %1170 }
  0xb3   :  { %v1007_v20 = vadd.f32 %v1006_v47, %v955_v39  ;;  %v480_v26 = vand.u32 2147483647, %v3136_v14  ;;  %3155 = vst [vmem:[#allocation34_spill] sm:$0xff] %v2409_v30  ;;  %v2412_v53 = vadd.f32 1.0, %v2402_v50  ;;  %1184 = vrcp.f32 %v2397_v16  ;;  %3156 = vst [vmem:[#allocation41_spill] sm:$0xff] %v2418_v13  ;;  %v2424_v49 = vpop.eup %1172 }
  0xb4   :  { %v2415_v8 = vmul.f32 0.6931472, %v1153_v51  ;;  %v489_v11 = vand.u32 2147483647, %v1818_v59  ;;  %v2421_v56 = vadd.f32 1.0, %v2409_v30  ;;  %1186 = vrcp.f32 %v2405_v46  ;;  %3157 = vst [vmem:[#allocation42_spill] sm:$0xff] %v2424_v49 }
  0xb5   :  { %v1008_v39 = vadd.f32 %v1007_v20, %v956_v37  ;;  %v487_v47 = vadd.f32 1.0, %v486_v6  ;;  %v2427_v7 = vadd.f32 1.0, %v2418_v13  ;;  %1188 = vrcp.f32 %v2412_v53 }
  0xb6   :  { %v2431_v51 = vmul.f32 %v3136_v14, %v478_v2  ;;  %v2436_v41 = vadd.f32 1.0, %v2424_v49  ;;  %1190 = vrcp.f32 %v2421_v56  ;;  %vm2442_vm13 = vcmp.lt.f32.partialorder %v480_v26, 0.0004427343  ;;  %v1175_v20 = vpop.eup %1174 }
  0xb7   :  { %1009 = vadd.xlane.f32.xlu1 %v1008_v39  ;;  %1192 = vrcp.f32 %v2427_v7  ;;  %v495_v2 = vmul.f32 -0.5, %v1826_v19  ;;  %v2459_v39 = vmul.f32 %v1818_v59, %v487_v47  ;;  %v504_v6 = vmul.f32 -0.5, %v3094_v10  ;;  %v3208_v57 = vld [vmem:[#allocation38_spill] sm:$0xff] }
  0xb8   :  { %v1177_v31 = vpop.eup %1176  ;;  %1194 = vrcp.f32 %v2436_v41  ;;  %v498_v63 = vand.u32 2147483647, %v1826_v19  ;;  %v513_v17 = vmul.f32 -0.5, %v3122_v29  ;;  %v507_v26 = vand.u32 2147483647, %v3094_v10 }
  0xb9   :  { %v522_v44 = vmul.f32 -0.5, %v3126_v61  ;;  %vm2482_vm2 = vcmp.lt.f32.partialorder %v489_v11, 0.0004427343  ;;  %v496_v40 = vadd.f32 1.0, %v495_v2  ;;  %v2487_v59 = vmul.f32 0.6931472, %v2344_v32 }
  0xba   :  { %v1179_v48 = vpop.eup %1178  ;;  %v505_v33 = vadd.f32 1.0, %v504_v6  ;;  %v2490_v5 = vmul.f32 0.6931472, %v1175_v20  ;;  %v514_v13 = vadd.f32 1.0, %v513_v17  ;;  %vm2493_vm5 = vcmp.lt.f32.partialorder %v498_v63, 0.0004427343 }
  0xbb   :  { %v1181_v43 = vpop.eup %1180  ;;  %v516_v11 = vand.u32 2147483647, %v3122_v29  ;;  %v523_v2 = vadd.f32 1.0, %v522_v44  ;;  %vm2499_vm6 = vcmp.lt.f32.partialorder %v507_v26, 0.0004427343  ;;  %v3173_v1 = vsel %vm2245_vm0, %v2374_v42, 1.0 }
  0xbc   :  { %v1183_v62 = vpop.eup %1182  ;;  %v649_v47 = vmul.f32 %v1181_v43, %v2377_v54  ;;  %v525_v17 = vand.u32 2147483647, %v3126_v61  ;;  %v2508_v21 = vmul.f32 0.6931472, %v1177_v31  ;;  %v2512_v26 = vmul.f32 %v3094_v10, %v505_v33 }
  0xbd   :  { %v1185_v0 = vpop.eup %1184  ;;  %v650_v30 = vmul.f32 %v1183_v62, %v2387_v22  ;;  %v2506_v22 = vmul.f32 %v1826_v19, %v496_v40  ;;  %vm2519_vm4 = vcmp.lt.f32.partialorder %v516_v11, 0.0004427343  ;;  %v2524_v19 = vmul.f32 %v3126_v61, %v523_v2 }
  0xbe   :  { %v1187_v49 = vpop.eup %1186  ;;  %v651_v32 = vmul.f32 %v1185_v0, %v2397_v16  ;;  %v665_v3 = vsub.f32 2.0, %v649_v47  ;;  %v2515_v47 = vmul.f32 %v3122_v29, %v514_v13  ;;  %v531_v31 = vmul.f32 -0.5, %v3140_v28 }
  0xbf   :  { %v1189_v6 = vpop.eup %1188  ;;  %v652_v20 = vmul.f32 %v1187_v49, %v2405_v46  ;;  %v666_v63 = vsub.f32 2.0, %v650_v30  ;;  %v491_v29 = vsel %vm2482_vm2, %v2459_v39, %v2415_v8  ;;  %vm2534_vm10 = vcmp.lt.f32.partialorder %v525_v17, 0.0004427343 }
  0xc0   :  { %v1191_v44 = vpop.eup %1190  ;;  %v653_v54 = vmul.f32 %v1189_v6, %v2412_v53  ;;  %v667_v16 = vsub.f32 2.0, %v651_v32  ;;  %v681_v27 = vmul.f32 %v1181_v43, %v665_v3  ;;  %v500_v13 = vsel %vm2493_vm5, %v2506_v22, %v2433_v45  ;;  %v3181_v43 = vld [vmem:[#allocation28_spill] sm:$0xff] }
  0xc1   :  { %v2517_v34 = vpop.eup %1192  ;;  %v654_v33 = vmul.f32 %v1191_v44, %v2421_v56  ;;  %v668_v10 = vsub.f32 2.0, %v652_v20  ;;  %v682_v3 = vmul.f32 %v1183_v62, %v666_v63  ;;  %v2544_v11 = vmul.f32 0.6931472, %v1179_v48  ;;  %v3175_v20 = vld [vmem:[#allocation24_spill] sm:$0xff] }
  0xc2   :  { %v2527_v40 = vpop.eup %1194  ;;  %v655_v61 = vmul.f32 %v2517_v34, %v2427_v7  ;;  %v669_v2 = vsub.f32 2.0, %v653_v54  ;;  %v683_v32 = vmul.f32 %v1185_v0, %v667_v16  ;;  %v509_v58 = vsel %vm2499_vm6, %v2512_v26, %v2487_v59  ;;  %v3171_v16 = vld [vmem:[#allocation22_spill] sm:$0xff] }
  0xc3   :  { %v518_v8 = vsel %vm2519_vm4, %v2515_v47, %v2490_v5  ;;  %v656_v62 = vmul.f32 %v2527_v40, %v2436_v41  ;;  %v3170_v48 = vsel %vm2238_vm7, %v2354_v12, 1.0  ;;  %v527_v25 = vsel %vm2534_vm10, %v2524_v19, %v2508_v21  ;;  %v3172_v5 = vld [vmem:[#allocation23_spill] sm:$0xff]  ;;  %v3178_v47 = vld [vmem:[#allocation25_spill] sm:$0xff]  ;;  %v3179_v19 = vld [vmem:[#allocation26_spill] sm:$0xff] }
  0xc4   :  { %v2560_v45 = vmul.f32 %v3170_v48, %v681_v27  ;;  %v532_v0 = vadd.f32 1.0, %v531_v31  ;;  %v670_v54 = vsub.f32 2.0, %v654_v33  ;;  %v684_v22 = vmul.f32 %v1187_v49, %v668_v10  ;;  %v3180_v33 = vld [vmem:[#allocation27_spill] sm:$0xff] }
  0xc5   :  { %v753_v14 = vsub.f32 0.0, %v3171_v16  ;;  %v754_v39 = vsub.f32 0.0, %v3172_v5  ;;  %v671_v59 = vsub.f32 2.0, %v655_v61  ;;  %v2572_v17 = vmul.f32 %v3173_v1, %v682_v3  ;;  %v3182_v3 = vld [vmem:[#allocation29_spill] sm:$0xff]  ;;  %v3187_v1 = vld [vmem:[#allocation16_spill] sm:$0xff] }
  0xc6   :  { %v534_v27 = vand.u32 2147483647, %v3140_v28  ;;  %v755_v63 = vsub.f32 0.0, %v3175_v20  ;;  %v685_v26 = vmul.f32 %v1189_v6, %v669_v2  ;;  %v3176_v49 = vsel %vm2255_vm11, %v2384_v23, 1.0  ;;  %v3183_v6 = vld [vmem:[#allocation14_spill] sm:$0xff]  ;;  %v3185_v2 = vld [vmem:[#allocation15_spill] sm:$0xff] }
  0xc7   :  { %3174 = vst [vmem:[#allocation43_spill] sm:$0xff] %v2572_v17  ;;  %v2580_v21 = vmul.f32 %v3176_v49, %v683_v32  ;;  %v756_v30 = vsub.f32 0.0, %v3178_v47  ;;  %v757_v31 = vsub.f32 0.0, %v3179_v19  ;;  %v533_v24 = vmul.f32 %v3140_v28, %v532_v0  ;;  %v3189_v28 = vld [vmem:[#allocation17_spill] sm:$0xff]  ;;  %v3193_v17 = vld [vmem:[#allocation18_spill] sm:$0xff] }
  0xc8   :  { %v758_v10 = vsub.f32 0.0, %v3180_v33  ;;  %v759_v61 = vsub.f32 0.0, %v3181_v43  ;;  %v760_v48 = vsub.f32 0.0, %v3182_v3  ;;  %vm3184_vm7 = vcmp.gt.f32.partialorder %v3183_v6, 0.5 }
  0xc9   :  { %3177 = vst [vmem:[#allocation22_spill] sm:$0xff] %v2580_v21  ;;  %v769_v38 = vsel %vm3184_vm7, %v753_v14, %v3171_v16  ;;  %vm3186_vm0 = vcmp.gt.f32.partialorder %v3185_v2, 0.5  ;;  %vm3188_vm11 = vcmp.gt.f32.partialorder %v3187_v1, 0.5  ;;  %vm3190_vm2 = vcmp.gt.f32.partialorder %v3189_v28, 0.5  ;;  %v3195_v14 = vld [vmem:[#allocation19_spill] sm:$0xff] }
  0xca   :  { %v770_v32 = vsel %vm3186_vm0, %v754_v39, %v3172_v5  ;;  %v771_v49 = vsel %vm3188_vm11, %v755_v63, %v3175_v20  ;;  %v772_v0 = vsel %vm3190_vm2, %v756_v30, %v3178_v47  ;;  %vm2600_vm5 = vcmp.lt.f32.partialorder %v534_v27, 0.0004427343  ;;  %v3197_v39 = vld [vmem:[#allocation21_spill] sm:$0xff] }
  0xcb   :  { %vm3194_vm6 = vcmp.gt.f32.partialorder %v3193_v17, 0.5  ;;  %vm3196_vm4 = vcmp.gt.f32.partialorder %v3195_v14, 0.5  ;;  %vm3198_vm10 = vcmp.gt.f32.partialorder %v3197_v39, 0.5  ;;  %v785_v63 = vmax.f32 %v769_v38, 0.0  ;;  %v3205_v38 = vld [vmem:[#allocation55_spill] sm:$0xff] }
  0xcc   :  { %v773_v16 = vsel %vm3194_vm6, %v757_v31, %v3179_v19  ;;  %v774_v5 = vsel %vm3196_vm4, %v758_v10, %v3180_v33  ;;  %v776_v20 = vsel %vm3198_vm10, %v760_v48, %v3182_v3  ;;  %v786_v6 = vmax.f32 %v770_v32, 0.0  ;;  %v3200_v31 = vld [vmem:[#allocation20_spill] sm:$0xff]  ;;  %v3209_v14 = vld [vmem:[#allocation39_spill] sm:$0xff] }
  0xcd   :  { %v787_v2 = vmax.f32 %v771_v49, 0.0  ;;  %v788_v47 = vmax.f32 %v772_v0, 0.0  ;;  %v672_v27 = vsub.f32 2.0, %v656_v62  ;;  %v686_v30 = vmul.f32 %v1191_v44, %v670_v54  ;;  %v3207_v0 = vld [vmem:[#allocation45_spill] sm:$0xff] }
  0xce   :  { %v3199_v1 = vsel %vm2267_vm15, %v2394_v35, 1.0  ;;  %v789_v19 = vmax.f32 %v773_v16, 0.0  ;;  %vm3201_vm7 = vcmp.gt.f32.partialorder %v3200_v31, 0.5  ;;  %v3202_v10 = vsel %vm2348_vm3, %v2342_v18, %v2339_v55 }
  0xcf   :  { %v2617_v17 = vmul.f32 %v3199_v1, %v684_v22  ;;  %v775_v33 = vsel %vm3201_vm7, %v759_v61, %v3181_v43  ;;  %v801_v3 = vadd.f32 %v785_v63, %v3202_v10  ;;  %v3203_v15 = vsel %vm2442_vm13, %v2431_v51, %v2381_v60  ;;  %v3204_v61 = vld [vmem:[#allocation46_spill] sm:$0xff] }
  0xd0   :  { %v802_v44 = vadd.f32 %v786_v6, %v3203_v15  ;;  %v803_v62 = vadd.f32 %v787_v2, %v491_v29  ;;  %v536_v54 = vsel %vm2600_vm5, %v533_v24, %v2544_v11  ;;  %v790_v22 = vmax.f32 %v774_v5, 0.0  ;;  %v3210_v5 = vld [vmem:[#allocation44_spill] sm:$0xff] }
  0xd1   :  { %v792_v48 = vmax.f32 %v776_v20, 0.0  ;;  %v804_v43 = vadd.f32 %v788_v47, %v500_v13  ;;  %v817_v4 = vmul.f32 %v3204_v61, %v3204_v61  ;;  %v818_v55 = vmul.f32 %v3205_v38, %v3205_v38  ;;  %v3211_v20 = vld [vmem:[#allocation36_spill] sm:$0xff]  ;;  %v3216_v47 = vld [vmem:[#allocation41_spill] sm:$0xff] }
  0xd2   :  { %v819_v18 = vmul.f32 %v2065_v36, %v2065_v36  ;;  %v820_v60 = vmul.f32 %v2213_v52, %v2213_v52  ;;  %v687_v51 = vmul.f32 %v2517_v34, %v671_v59  ;;  %v3206_v37 = vsel %vm2279_vm14, %v2402_v50, 1.0 }
  0xd3   :  { %v2648_v29 = vmul.f32 %v3206_v37, %v685_v26  ;;  %v791_v13 = vmax.f32 %v775_v33, 0.0  ;;  %v805_v11 = vadd.f32 %v789_v19, %v509_v58  ;;  %v821_v21 = vmul.f32 %v2233_v9, %v2233_v9  ;;  %v3219_v33 = vld [vmem:[#allocation42_spill] sm:$0xff] }
  0xd4   :  { %v833_v24 = vmul.f32 %v817_v4, %v801_v3  ;;  %v834_v32 = vmul.f32 %v818_v55, %v802_v44  ;;  %v835_v49 = vmul.f32 %v819_v18, %v803_v62  ;;  %v688_v36 = vmul.f32 %v2527_v40, %v672_v27  ;;  %v3221_v62 = vld [vmem:[#allocation40_spill] sm:$0xff] }
  0xd5   :  { %v806_v28 = vadd.f32 %v790_v22, %v518_v8  ;;  %v808_v52 = vadd.f32 %v792_v48, %v536_v54  ;;  %v822_v34 = vmul.f32 %v3207_v0, %v3207_v0  ;;  %v824_v59 = vmul.f32 %v3208_v57, %v3208_v57  ;;  %v3213_v8 = vld [vmem:[#allocation34_spill] sm:$0xff] }
  0xd6   :  { %v836_v26 = vmul.f32 %v820_v60, %v804_v43  ;;  %v958_v16 = vadd.f32 %v834_v32, %v833_v24  ;;  %1196 = vlog2.f32 %v3209_v14  ;;  %v807_v58 = vadd.f32 %v791_v13, %v527_v25 }
  0xd7   :  { %v823_v9 = vmul.f32 %v3210_v5, %v3210_v5  ;;  %v540_v39 = vmul.f32 -0.5, %v2354_v12  ;;  %1198 = vlog2.f32 %v3211_v20  ;;  %v3214_v63 = vsel %vm2291_vm8, %v3213_v8, 1.0 }
  0xd8   :  { %v2666_v6 = vmul.f32 %v3214_v63, %v686_v30  ;;  %v3217_v27 = vsel %vm2307_vm12, %v3216_v47, 1.0  ;;  %v837_v25 = vmul.f32 %v821_v21, %v805_v11  ;;  %v959_v19 = vadd.f32 %v958_v16, %v835_v49 }
  0xd9   :  { %v2672_v1 = vmul.f32 %v3217_v27, %v687_v51  ;;  %v3220_v10 = vsel %vm2330_vm1, %v3219_v33, 1.0  ;;  %v838_v15 = vmul.f32 %v822_v34, %v806_v28  ;;  %v549_v44 = vmul.f32 -0.5, %v2374_v42  ;;  %v3232_v27 = vld [vmem:[#allocation56_spill] sm:$0xff] }
  0xda   :  { %v2678_v3 = vmul.f32 %v3220_v10, %v688_v36  ;;  %1200 = vlog2.f32 %v3221_v62  ;;  %v840_v30 = vmul.f32 %v824_v59, %v808_v52  ;;  %v960_v54 = vadd.f32 %v959_v19, %v836_v26  ;;  %v3233_v19 = vld [vmem:[#allocation57_spill] sm:$0xff] }
  0xdb   :  { %v543_v22 = vand.u32 2147483647, %v2354_v12  ;;  %1202 = vlog2.f32 %v2405_v46  ;;  %v839_v48 = vmul.f32 %v823_v9, %v807_v58  ;;  %v541_v43 = vadd.f32 1.0, %v540_v39  ;;  %v3222_v46 = vld [vmem:[#allocation31_spill] sm:$0xff] }
  0xdc   :  { %v552_v61 = vand.u32 2147483647, %v2374_v42  ;;  %v558_v4 = vmul.f32 -0.5, %v2384_v23  ;;  %v961_v38 = vadd.f32 %v960_v54, %v837_v25  ;;  %v561_v55 = vand.u32 2147483647, %v2384_v23  ;;  %v3239_v54 = vld [vmem:[#allocation59_spill] sm:$0xff] }
  0xdd   :  { %v567_v18 = vmul.f32 -0.5, %v2394_v35  ;;  %1204 = vlog2.f32 %v2412_v53  ;;  %v550_v60 = vadd.f32 1.0, %v549_v44  ;;  %v570_v51 = vand.u32 2147483647, %v2394_v35  ;;  %v3250_v53 = vld [vmem:[#allocation50_spill] sm:$0xff] }
  0xde   :  { %v576_v37 = vmul.f32 -0.5, %v2402_v50  ;;  %1206 = vlog2.f32 %v2421_v56  ;;  %vm3223_vm15 = vcmp.lt.s32.totalorder %v3222_v46, 1000  ;;  %v962_v11 = vadd.f32 %v961_v38, %v838_v15  ;;  %v3262_v15 = vld [vmem:[#allocation43_spill] sm:$0xff] }
  0xdf   :  { %v932_v13 = vsel %vm3223_vm15, %v840_v30, 0.0  ;;  %vm2694_vm14 = vcmp.lt.f32.partialorder %v543_v22, 0.0004427343  ;;  %v585_v24 = vmul.f32 -0.5, %v3213_v8  ;;  %v2700_v32 = vmul.f32 %v2354_v12, %v541_v43 }
  0xe0   :  { %vm2702_vm8 = vcmp.lt.f32.partialorder %v552_v61, 0.0004427343  ;;  %v559_v49 = vadd.f32 1.0, %v558_v4  ;;  %v594_v56 = vmul.f32 -0.5, %v3216_v47  ;;  %v1197_v36 = vpop.eup %1196  ;;  %v963_v28 = vadd.f32 %v962_v11, %v839_v48  ;;  %v3240_v48 = vld [vmem:[#allocation60_spill] sm:$0xff] }
  0xe1   :  { %vm2707_vm12 = vcmp.lt.f32.partialorder %v561_v55, 0.0004427343  ;;  %v568_v0 = vadd.f32 1.0, %v567_v18  ;;  %1208 = vlog2.f32 %v2427_v7  ;;  %v1199_v34 = vpop.eup %1198  ;;  %v2713_v12 = vmul.f32 %v2374_v42, %v550_v60  ;;  %v3243_v60 = vld [vmem:[#allocation61_spill] sm:$0xff] }
  0xe2   :  { %vm2715_vm1 = vcmp.lt.f32.partialorder %v570_v51, 0.0004427343  ;;  %v577_v59 = vadd.f32 1.0, %v576_v37  ;;  %v579_v26 = vand.u32 2147483647, %v2402_v50  ;;  %v964_v14 = vadd.f32 %v963_v28, %v932_v13  ;;  %v3244_v37 = vld [vmem:[#allocation47_spill] sm:$0xff] }
  0xe3   :  { %v588_v16 = vand.u32 2147483647, %v3213_v8  ;;  %v586_v58 = vadd.f32 1.0, %v585_v24  ;;  %v597_v5 = vand.u32 2147483647, %v3216_v47  ;;  %1210 = vlog2.f32 %v2436_v41  ;;  %v3246_v13 = vld [vmem:[#allocation48_spill] sm:$0xff] }
  0xe4   :  { %v1201_v7 = vpop.eup %1200  ;;  %v539_v9 = vmul.f32 0.6931472, %v1197_v36  ;;  %v548_v39 = vmul.f32 0.6931472, %v1199_v34  ;;  %v560_v42 = vmul.f32 %v2384_v23, %v559_v49  ;;  %v595_v20 = vadd.f32 1.0, %v594_v56  ;;  %965 = vadd.xlane.f32.xlu0 %v964_v14  ;;  %v3238_v23 = vld [vmem:[#allocation58_spill] sm:$0xff] }
  0xe5   :  { %v1203_v40 = vpop.eup %1202  ;;  %v569_v63 = vmul.f32 %v2394_v35, %v568_v0  ;;  %v603_v2 = vmul.f32 -0.5, %v3219_v33  ;;  %v761_v25 = vsub.f32 0.0, %v3232_v27  ;;  %v762_v31 = vsub.f32 0.0, %v3233_v19  ;;  %v3252_v0 = vld [vmem:[#allocation62_spill] sm:$0xff] }
  0xe6   :  { %v578_v10 = vmul.f32 %v2402_v50, %v577_v59  ;;  %vm2729_vm3 = vcmp.lt.f32.partialorder %v579_v26, 0.0004427343  ;;  %vm2733_vm13 = vcmp.lt.f32.partialorder %v588_v16, 0.0004427343  ;;  %v763_v44 = vsub.f32 0.0, %v3238_v23  ;;  %v3255_v26 = vld [vmem:[#allocation63_spill] sm:$0xff] }
  0xe7   :  { %v1205_v62 = vpop.eup %1204  ;;  %v557_v35 = vmul.f32 0.6931472, %v1201_v7  ;;  %v587_v30 = vmul.f32 %v3213_v8, %v586_v58  ;;  %v764_v22 = vsub.f32 0.0, %v3239_v54  ;;  %v765_v43 = vsub.f32 0.0, %v3240_v48 }
  0xe8   :  { %v1207_v61 = vpop.eup %1206  ;;  %v545_v50 = vsel %vm2694_vm14, %v2700_v32, %v539_v9  ;;  %v554_v4 = vsel %vm2702_vm8, %v2713_v12, %v548_v39  ;;  %v566_v38 = vmul.f32 0.6931472, %v1203_v40  ;;  %v596_v55 = vmul.f32 %v3216_v47, %v595_v20  ;;  %v3248_v32 = vld [vmem:[#allocation49_spill] sm:$0xff]  ;;  %v3253_v12 = vld [vmem:[#allocation51_spill] sm:$0xff]  ;;  %v3256_v39 = vld [vmem:[#allocation52_spill] sm:$0xff] }
  0xe9   :  { %vm2748_vm0 = vcmp.lt.f32.partialorder %v597_v5, 0.0004427343  ;;  %v604_v8 = vadd.f32 1.0, %v603_v2  ;;  %v766_v51 = vsub.f32 0.0, %v3243_v60  ;;  %vm3245_vm11 = vcmp.gt.f32.partialorder %v3244_v37, 0.5 }
  0xea   :  { %v777_v46 = vsel %vm3245_vm11, %v761_v25, %v3232_v27  ;;  %vm3247_vm2 = vcmp.gt.f32.partialorder %v3246_v13, 0.5  ;;  %v575_v21 = vmul.f32 0.6931472, %v1205_v62  ;;  %v584_v24 = vmul.f32 0.6931472, %v1207_v61 }
  0xeb   :  { %v778_v11 = vsel %vm3247_vm2, %v762_v31, %v3233_v19  ;;  %vm3249_vm5 = vcmp.gt.f32.partialorder %v3248_v32, 0.5  ;;  %vm3251_vm6 = vcmp.gt.f32.partialorder %v3250_v53, 0.5  ;;  %v1209_v56 = vpop.eup %1208  ;;  %v563_v36 = vsel %vm2707_vm12, %v560_v42, %v557_v35  ;;  %v3258_v19 = vld [vmem:[#allocation53_spill] sm:$0xff] }
  0xec   :  { %v779_v47 = vsel %vm3249_vm5, %v763_v44, %v3238_v23  ;;  %v780_v49 = vsel %vm3251_vm6, %v764_v22, %v3239_v54  ;;  %v606_v28 = vand.u32 2147483647, %v3219_v33  ;;  %v767_v34 = vsub.f32 0.0, %v3252_v0  ;;  %v3260_v44 = vld [vmem:[#allocation54_spill] sm:$0xff] }
  0xed   :  { %vm3254_vm4 = vcmp.gt.f32.partialorder %v3253_v12, 0.5  ;;  %v768_v16 = vsub.f32 0.0, %v3255_v26  ;;  %v793_v14 = vmax.f32 %v777_v46, 0.0  ;;  %v794_v58 = vmax.f32 %v778_v11, 0.0  ;;  %v1211_v7 = vpop.eup %1210  ;;  %v3263_v54 = vld [vmem:[#allocation22_spill] sm:$0xff]  ;;  %v3266_v11 = vld [vmem:[#allocation35_spill] sm:$0xff] }
  0xee   :  { %v781_v59 = vsel %vm3254_vm4, %v765_v43, %v3240_v48  ;;  %v795_v5 = vmax.f32 %v779_v47, 0.0  ;;  %v572_v9 = vsel %vm2715_vm1, %v569_v63, %v566_v38  ;;  %v605_v52 = vmul.f32 %v3219_v33, %v604_v8 }
  0xef   :  { %vm3257_vm10 = vcmp.gt.f32.partialorder %v3256_v39, 0.5  ;;  %v796_v20 = vmax.f32 %v780_v49, 0.0  ;;  %v581_v40 = vsel %vm2729_vm3, %v578_v10, %v575_v21  ;;  %v590_v2 = vsel %vm2733_vm13, %v587_v30, %v584_v24 }
  0xf0   :  { %v782_v42 = vsel %vm3257_vm10, %v766_v51, %v3243_v60  ;;  %v593_v27 = vmul.f32 0.6931472, %v1209_v56  ;;  %v797_v25 = vmax.f32 %v781_v59, 0.0  ;;  %vm3259_vm7 = vcmp.gt.f32.partialorder %v3258_v19, 0.5 }
  0xf1   :  { %v783_v57 = vsel %vm3259_vm7, %v767_v34, %v3252_v0  ;;  %v809_v63 = vadd.f32 %v793_v14, %v545_v50  ;;  %v810_v31 = vadd.f32 %v794_v58, %v554_v4  ;;  %v811_v33 = vadd.f32 %v795_v5, %v563_v36 }
  0xf2   :  { %v602_v23 = vmul.f32 0.6931472, %v1211_v7  ;;  %vm3261_vm15 = vcmp.gt.f32.partialorder %v3260_v44, 0.5  ;;  %v798_v35 = vmax.f32 %v782_v42, 0.0  ;;  %v812_v41 = vadd.f32 %v796_v20, %v572_v9 }
  0xf3   :  { %v784_v62 = vsel %vm3261_vm15, %v768_v16, %v3255_v26  ;;  %v825_v10 = vmul.f32 %v2560_v45, %v2560_v45  ;;  %v826_v30 = vmul.f32 %v3262_v15, %v3262_v15  ;;  %v827_v22 = vmul.f32 %v3263_v54, %v3263_v54 }
  0xf4   :  { %v828_v48 = vmul.f32 %v2617_v17, %v2617_v17  ;;  %vm2797_vm14 = vcmp.lt.f32.partialorder %v606_v28, 0.0004427343  ;;  %v799_v61 = vmax.f32 %v783_v57, 0.0  ;;  %v813_v50 = vadd.f32 %v797_v25, %v581_v40 }
  0xf5   :  { %v829_v4 = vmul.f32 %v2648_v29, %v2648_v29  ;;  %v599_v45 = vsel %vm2748_vm0, %v596_v55, %v593_v27  ;;  %v841_v38 = vmul.f32 %v825_v10, %v809_v63  ;;  %v842_v8 = vmul.f32 %v826_v30, %v810_v31 }
  0xf6   :  { %v843_v60 = vmul.f32 %v827_v22, %v811_v33  ;;  %v800_v51 = vmax.f32 %v784_v62, 0.0  ;;  %v814_v37 = vadd.f32 %v798_v35, %v590_v2  ;;  %v830_v17 = vmul.f32 %v2666_v6, %v2666_v6 }
  0xf7   :  { %v844_v46 = vmul.f32 %v828_v48, %v812_v41  ;;  %v608_v13 = vsel %vm2797_vm14, %v605_v52, %v602_v23  ;;  %vm3267_vm8 = vcmp.lt.s32.totalorder %v3266_v11, 12  ;;  %v815_v18 = vadd.f32 %v799_v61, %v599_v45 }
  0xf8   :  { %v933_v21 = vsel %vm3267_vm8, %v841_v38, 0.0  ;;  %vm3268_vm12 = vmmov %vm3267_vm8  ;;  %v831_v55 = vmul.f32 %v2672_v1, %v2672_v1  ;;  %v845_v24 = vmul.f32 %v829_v4, %v813_v50  ;;  %v816_v6 = vadd.f32 %v800_v51, %v608_v13 }
  0xf9   :  { %v934_v29 = vsel %vm3268_vm12, %v842_v8, 0.0  ;;  %vm3269_vm1 = vmmov %vm3267_vm8  ;;  %v832_v53 = vmul.f32 %v2678_v3, %v2678_v3  ;;  %v846_v49 = vmul.f32 %v830_v17, %v814_v37  ;;  %vm976_vm2 = vcmask 7168  }
  0xfa   :  { %v935_v32 = vsel %vm3269_vm1, %v843_v60, 0.0  ;;  %v967_v47 = vadd.f32 %v934_v29, %v933_v21  ;;  %vm3270_vm3 = vmmov %vm3269_vm1  ;;  %v847_v28 = vmul.f32 %v831_v55, %v815_v18  ;;  %v1001_v7 = vpop.xlane.xlu1 %1000 }
  0xfb   :  { %v936_v56 = vsel %vm3270_vm3, %v844_v46, 0.0  ;;  %vm3271_vm13 = vmmov %vm3269_vm1  ;;  %v848_v1 = vmul.f32 %v832_v53, %v816_v6  ;;  %v1011_v9 = vsel %vm976_vm2, %v1001_v7, 0.0 }
  0xfc   :  { %v968_v36 = vadd.f32 %v967_v47, %v935_v32  ;;  %v937_v0 = vsel %vm3271_vm13, %v845_v24, 0.0  ;;  %vm3272_vm0 = vmmov %vm3269_vm1 }
  0xfd   :  { %v938_v12 = vsel %vm3272_vm0, %v846_v49, 0.0  ;;  %vm3273_vm11 = vmmov %vm3272_vm0  ;;  %v940_v14 = vsel %vm2369_vm9, %v848_v1, 0.0 }
  0xfe   :  { %v969_v34 = vadd.f32 %v968_v36, %v936_v56  ;;  %v939_v26 = vsel %vm3273_vm11, %v847_v28, 0.0 }
 0x100   :  { %v970_v59 = vadd.f32 %v969_v34, %v937_v0 }
 0x102   :  { %v971_v16 = vadd.f32 %v970_v59, %v938_v12 }
 0x104   :  { %v972_v58 = vadd.f32 %v971_v16, %v939_v26 }
 0x106   :  { %v973_v5 = vadd.f32 %v972_v58, %v940_v14 }
 0x108   :  { %974 = vadd.xlane.f32.xlu0 %v973_v5 }
 0x144   :  { %v1010_v52 = vpop.xlane.xlu1 %1009 }
 0x145   :  { %v1012_v39 = vsel %vm976_vm2, %v1010_v52, 0.0 }
 0x146   :  { %v1013_v42 = vadd.f32 %v1012_v39, %v1011_v9 }
 0x148   :  { %1014 = vadd.xlane.f32.xlu1 %v1013_v42 }
 0x171   :  { %v966_v20 = vpop.xlane.xlu0 %965 }
 0x172   :  { %v977_v2 = vsel %vm976_vm2, %v966_v20, 0.0 }
 0x195   :  { %v975_v40 = vpop.xlane.xlu0 %974 }
 0x196   :  { %v978_v27 = vsel %vm976_vm2, %v975_v40, 0.0 }
 0x197   :  { %v979_v25 = vadd.f32 %v978_v27, %v977_v2 }
 0x199   :  { %980 = vadd.xlane.f32.xlu0 %v979_v25 }
 0x1d5   :  { %v1015_v19 = vpop.xlane.xlu1 %1014 }
 0x1d6   :  { %v1016_v57 = vrot.slane %v1015_v19, 4 }
 0x1d8   :  { %v1017_v63 = vadd.f32 %v1016_v57, %v1015_v19 }
 0x1da   :  { %v1018_v31 = vrot.slane %v1017_v63, 2 }
 0x1dc   :  { %v1019_v62 = vadd.f32 %v1018_v31, %v1017_v63 }
 0x1de   :  { %v1020_v10 = vrot.slane %v1019_v62, 1 }
 0x1e0   :  { %v1021_v54 = vadd.f32 %v1020_v10, %v1019_v62 }
 0x226   :  { %v981_v33 = vpop.xlane.xlu0 %980 }
 0x227   :  { %v982_v23 = vrot.slane %v981_v33, 4 }
 0x229   :  { %v983_v44 = vadd.f32 %v982_v23, %v981_v33 }
 0x22b   :  { %v984_v35 = vrot.slane %v983_v44, 2 }
 0x22d   :  { %v985_v41 = vadd.f32 %v984_v35, %v983_v44 }
 0x22f   :  { %v986_v15 = vrot.slane %v985_v41, 1 }
 0x231   :  { %v987_v30 = vadd.f32 %v986_v15, %v985_v41 }
 0x233   :  { %1072 = vpush %v987_v30 }
 0x234   :  { %1074 = vpush %v1021_v54 }
 0x264   :  { %s1073_s11 = spop %1072 }
 0x265   :  { %v989_v22 = vstv %s1073_s11  ;;  %s1075_s14 = spop %1074 }
 0x266   :  { %v1023_v48 = vstv %s1075_s14  ;;  %991 = vst [vmem:[#allocation7] sm:$0xff] %v989_v22 }
 0x267   :  { %1025 = vst [vmem:[#allocation8] sm:$0xff] %v1023_v48 }
 0x268   :  { %1267 = shalt.err (!%p1264_p6)
}
 0x269   :  { %s1268_s18 = scalar_lea.hbm %s2855_s2, 128 }
 0x26a   :  { %p1269_p7 = scmp.ne.s32.totalorder %s2855_s2, %s1268_s18  ;;  %p1272_p8 = scmp.lt.u32.totalorder %s1268_s18, %s2855_s2 }
 0x26c   :  { %p1274_p9 = pnand %p1272_p8, %p1269_p7 }
 0x26e   :  { %1277 = shalt.err (!%p1274_p9)
}
 0x26f   :  { %1035 = dma.vmem_to_hbm [thread:$0]  %s1033_s10, 128, %s2855_s2, [#allocation4]  }
 0x270   :  { %s1278_s25 = scalar_lea.vmem %s1043_s13, 128  ;;  %p1283_p11 = scmp.lt.s32.totalorder %s1043_s13, %s1043_s13 }
 0x271   :  { %p1279_p10 = scmp.ne.s32.totalorder %s1043_s13, %s1278_s25  ;;  %p1284_p12 = scmp.lt.s32.totalorder %s1278_s25, %s1278_s25 }
 0x273   :  { %p1285_p13 = por %p1284_p12, %p1283_p11 }
 0x275   :  { %p1286_p0 = pnand %p1285_p13, %p1279_p10 }
 0x277   :  { %1289 = shalt.err (!%p1286_p0)
}
 0x278   :  { %s1290_s28 = scalar_lea.hbm %s2856_s3, 128 }
 0x279   :  { %p1291_p1 = scmp.ne.s32.totalorder %s2856_s3, %s1290_s28  ;;  %p1294_p2 = scmp.lt.u32.totalorder %s1290_s28, %s2856_s3 }
 0x27b   :  { %p1296_p3 = pnand %p1294_p2, %p1291_p1 }
 0x27d   :  { %1299 = shalt.err (!%p1296_p3)
}
 0x27e   :  { %1045 = dma.vmem_to_hbm [thread:$0]  %s1043_s13, 128, %s2856_s3, [#allocation9]  }
 0x27f   :  { %1304 = dma.done.wait [#allocation4], 128  }
 0x280   :  { %1305 = vsyncadd [#allocation4], 4294967168 }
 0x281   :  { %1306 = dma.done.wait [#allocation9], 128  }
 0x282   :  { %1307 = vsyncadd [#allocation9], 4294967168 }
 0x283   :  { %1052 = vsyncpa [#allocation3], 1 }
 0x284   :  { %1053 = vsyncpa [#allocation6], 1 }
 0x285   :  { %1054 = vsyncpa [#allocation4], 1 }
 0x286   :  { %1055 = vsyncpa [#allocation9], 1 }

</bundles_post_ra>
